<compile_context>
chip_gen: v7x
topology: tpu7x:2x2x1
jax: 0.10.0
libtpu: 0.0.40
codegen_flags: <defaults>
</compile_context>

<pallas_src>
import functools

import numpy as np

import jax
import jax.numpy as jnp
from jax.experimental import pallas as pl
from jax.experimental.pallas import tpu as pltpu


# ----------------------------------------------------------------------------
# The single fused kernel: 5 batched matmuls, fully VMEM resident
# ----------------------------------------------------------------------------
def _fused_vae_kernel(x_ref, eps_ref,
                      w1_ref, b1_ref, w2_ref, b2_ref,
                      wh_ref, bh_ref,
                      wd1z_ref, wd1p_ref, bd1_ref, wd2_ref, bd2_ref,
                      xrec_ref, z_ref, pose_ref, mu_ref, lv_ref,
                      *, latent, pose_ch):
    """Whole AffinityVAE forward for a small batch.

    Each conv is ONE matmul whose RHS (built at init) encodes the full
    stride-2 / pad-1 patch geometry; the heads are ONE packed matmul whose
    rows were permuted at init to match PyTorch's NCHW flatten order.
    """
    f32, bf16 = jnp.float32, jnp.bfloat16
    L, P = latent, pose_ch

    def mm(a_bf16, w_ref):  # MXU: bf16 x bf16 -> f32 accumulate
        return jnp.dot(a_bf16, w_ref[...], preferred_element_type=f32)

    # ---- encoder: conv1 (k3,s2,p1)+ReLU, conv2 (k3,s2,p1)+ReLU -------------
    a1 = mm(x_ref[...], w1_ref) + b1_ref[...]              # (B, H1*W1*C1) f32
    a1 = jnp.maximum(a1, 0.0).astype(bf16)                 # cast once after ReLU

    a2 = mm(a1, w2_ref) + b2_ref[...]                      # (B, H2*W2*C2) f32
    a2 = jnp.maximum(a2, 0.0).astype(bf16)

    # ---- packed heads: mu | log_var | pose ----------------------------------
    heads = mm(a2, wh_ref) + bh_ref[...]                   # (B, 2L+P) f32
    mu = heads[:, 0:L]
    lv = heads[:, L:2 * L]
    pose = heads[:, 2 * L:2 * L + P]

    # ---- reparameterise: z = eps * exp(0.5*log_var) + mu  (all f32, EUP exp)
    z = eps_ref[...] * jnp.exp(0.5 * lv) + mu               # (B, L)

    # ---- decoder MLP (latents consumed as values, no ref round trip) --------
    h = mm(z.astype(bf16), wd1z_ref)                        # (B, 128)
    if P == 1:                                              # avoid a K=1 matmul
        h = h + pose * wd1p_ref[...]                        # VPU broadcast (f32)
    else:
        h = h + jnp.dot(pose.astype(bf16), wd1p_ref[...].astype(bf16),
                        preferred_element_type=f32)
    h = jnp.maximum(h + bd1_ref[...], 0.0).astype(bf16)     # (B, 128)
    xrec_ref[...] = mm(h, wd2_ref) + bd2_ref[...]           # (B, C*S*S): lane-dense store

    # ---- tiny latent outputs, stored once at the end ------------------------
    z_ref[...] = z
    pose_ref[...] = pose
    mu_ref[...] = mu
    lv_ref[...] = lv


# ----------------------------------------------------------------------------
# Model: synthetic encoder / decoder with deterministic params
# ----------------------------------------------------------------------------
class AffinityVAEPallas:
    def __init__(self, key, *, in_channels=4, img_size=16,
                 latent_dims=8, pose_channels=1):
        assert img_size % 4 == 0, "two stride-2 convs need img_size % 4 == 0"
        self.in_channels = in_channels
        self.img_size = img_size
        self.latent_dims = latent_dims
        self.pose_channels = pose_channels
        self.c1, self.c2 = 8, 16
        self.h1, self.h2 = img_size // 2, img_size // 4
        self.flat_shape = self.c2 * self.h2 * self.h2
        dec_hidden = 128
        out_flat = in_channels * img_size * img_size

        def init(k, shape, scale=0.05):
            w = scale * jax.random.normal(k, shape, dtype=jnp.float32)
            # snap to the bf16 grid so the bf16-matmul kernel and the f32-stored
            # reference use numerically identical weights
            return w.astype(jnp.bfloat16).astype(jnp.float32)

        ks = jax.random.split(key, 14)
        # PyTorch-layout parameters (Conv2d: (C_out, C_in, k, k); Linear: (in, out))
        self.conv1_w = init(ks[0], (self.c1, in_channels, 3, 3))
        self.conv1_b = init(ks[1], (self.c1,))
        self.conv2_w = init(ks[2], (self.c2, self.c1, 3, 3))
        self.conv2_b = init(ks[3], (self.c2,))
        self.mu_w = init(ks[4], (self.flat_shape, latent_dims))
        self.mu_b = init(ks[5], (latent_dims,))
        self.lv_w = init(ks[6], (self.flat_shape, latent_dims))
        self.lv_b = init(ks[7], (latent_dims,))
        self.pose_w = init(ks[8], (self.flat_shape, pose_channels))
        self.pose_b = init(ks[9], (pose_channels,))
        self.dec1_w = init(ks[10], (latent_dims + pose_channels, dec_hidden))
        self.dec1_b = init(ks[11], (dec_hidden,))
        self.dec2_w = init(ks[12], (dec_hidden, out_flat))
        self.dec2_b = init(ks[13], (out_flat,))

        self.prepared = self._prepare_kernel_params()
        self._fwd = jax.jit(self._forward_impl)

    # ---- repack PyTorch-layout weights into the kernel's fused layouts ------
    def _prepare_kernel_params(self):
        C, S = self.in_channels, self.img_size
        C1, C2, H1, H2 = self.c1, self.c2, self.h1, self.h2
        L, P = self.latent_dims, self.pose_channels
        f32, bf16 = jnp.float32, jnp.bfloat16

        def conv_rhs(w, in_h, in_w, out_h, out_w):
            # One matmul RHS per conv: input lanes = (ih, iw, ci) flatten,
            # output lanes = (oh, ow, co) flatten; stride 2 / pad 1 geometry
            # is encoded in the block placement (pad rows/cols simply absent).
            w = np.asarray(w, np.float32)
            co, ci = w.shape[0], w.shape[1]
            rhs = np.zeros((in_h * in_w * ci, out_h * out_w * co), np.float32)
            for oh in range(out_h):
                for ki in range(3):
                    ih = 2 * oh + ki - 1
                    if not 0 <= ih < in_h:
                        continue
                    for ow in range(out_w):
                        for kj in range(3):
                            iw = 2 * ow + kj - 1
                            if not 0 <= iw < in_w:
                                continue
                            r0 = (ih * in_w + iw) * ci
                            c0 = (oh * out_w + ow) * co
                            rhs[r0:r0 + ci, c0:c0 + co] = w[:, :, ki, kj].T
            return rhs

        w1 = conv_rhs(self.conv1_w, S, S, H1, H1)      # (S*S*C,    H1*H1*C1) = (1024, 512)
        w2 = conv_rhs(self.conv2_w, H1, H1, H2, H2)    # (H1*H1*C1, H2*H2*C2) = ( 512, 256)
        b1 = np.tile(np.asarray(self.conv1_b, np.float32), H1 * H1).reshape(1, -1)
        b2 = np.tile(np.asarray(self.conv2_b, np.float32), H2 * H2).reshape(1, -1)

        # pack mu|log_var|pose into one weight; permute rows from PyTorch
        # NCHW-flatten order (c2, oh, ow) to the kernel's (oh, ow, c2) lane order.
        w_heads = np.concatenate([np.asarray(self.mu_w, np.float32),
                                  np.asarray(self.lv_w, np.float32),
                                  np.asarray(self.pose_w, np.float32)], axis=1)
        wh = np.zeros((H2 * H2 * C2, 2 * L + P), np.float32)
        for oh in range(H2):
            for ow in range(H2):
                for co in range(C2):
                    wh[(oh * H2 + ow) * C2 + co] = w_heads[co * H2 * H2 + oh * H2 + ow]
        bh = np.concatenate([np.asarray(self.mu_b, np.float32),
                             np.asarray(self.lv_b, np.float32),
                             np.asarray(self.pose_b, np.float32)]).reshape(1, -1)

        d1 = np.asarray(self.dec1_w, np.float32)
        return dict(
            w1=jnp.asarray(w1, bf16), b1=jnp.asarray(b1, f32),
            w2=jnp.asarray(w2, bf16), b2=jnp.asarray(b2, f32),
            wh=jnp.asarray(wh, bf16), bh=jnp.asarray(bh, f32),
            wd1z=jnp.asarray(d1[:L], bf16),
            wd1p=jnp.asarray(d1[L:], f32),     # (P,128); used on the VPU when P==1
            bd1=jnp.asarray(np.asarray(self.dec1_b, np.float32).reshape(1, -1), f32),
            wd2=jnp.asarray(self.dec2_w, bf16),
            bd2=jnp.asarray(np.asarray(self.dec2_b, np.float32).reshape(1, -1), f32),
        )

    # ---- forward (matches AffinityVAE.forward) ------------------------------
    def _forward_impl(self, x, eps):
        B = x.shape[0]
        C, S = self.in_channels, self.img_size
        L, P = self.latent_dims, self.pose_channels
        p = self.prepared

        # Only layout plumbing outside the kernel: NCHW -> NHWC flatten
        # (lanes = (h, w, c), channel fastest) + a single bf16 cast.  All conv
        # patch extraction / stride / padding lives in the RHS matrices.
        x_flat = (jnp.transpose(x, (0, 2, 3, 1))
                  .reshape(B, S * S * C).astype(jnp.bfloat16))

        out_shape = (
            jax.ShapeDtypeStruct((B, C * S * S), jnp.float32),    # x_rec (flat, lane-dense)
            jax.ShapeDtypeStruct((B, L), jnp.float32),            # z
            jax.ShapeDtypeStruct((B, P), jnp.float32),            # pose
            jax.ShapeDtypeStruct((B, L), jnp.float32),            # mu
            jax.ShapeDtypeStruct((B, L), jnp.float32),            # log_var
        )
        vmem = pl.BlockSpec(memory_space=pltpu.MemorySpace.VMEM)
        kernel = functools.partial(_fused_vae_kernel, latent=L, pose_ch=P)
        # NOTE: grid=() -- at B=2 the whole forward is one VMEM-resident step
        # (~1.6 MiB of operands).  If batch grows, add a grid axis over batch
        # with dimension_semantics=("parallel",) so both v7x TensorCores are
        # used, and re-budget block sizes against v7x's 64 MiB VMEM
        # (32 MiB scoped default).
        x_rec_flat, z, pose, mu, log_var = pl.pallas_call(
            kernel,
            out_shape=out_shape,
            in_specs=[vmem] * 13,
            out_specs=(vmem,) * 5,
        )(x_flat, eps, p["w1"], p["b1"], p["w2"], p["b2"], p["wh"], p["bh"],
          p["wd1z"], p["wd1p"], p["bd1"], p["wd2"], p["bd2"])

        return x_rec_flat.reshape(B, C, S, S), z, pose, mu, log_var

    def __call__(self, x, *, eps=None, key=None):
        if eps is None:
            eps = jax.random.normal(key, (x.shape[0], self.latent_dims),
                                    dtype=jnp.float32)
        return self._fwd(x, eps)


# ----------------------------------------------------------------------------
# Pure-JAX reference (same bf16-matmul / f32-element-wise policy) for checking
# ----------------------------------------------------------------------------
def _reference_conv(x_nchw, w, b):
    k, stride, pad = 3, 2, 1
    B, Ci, H, W = x_nchw.shape
    Co = w.shape[0]
    xp = jnp.pad(x_nchw, ((0, 0), (0, 0), (pad, pad), (pad, pad)))
    Ho = (H + 2 * pad - k) // stride + 1
    Wo = (W + 2 * pad - k) // stride + 1
    cols = []
    for ki in range(k):
        for kj in range(k):
            cols.append(xp[:, :, ki:ki + stride * Ho:stride, kj:kj + stride * Wo:stride])
    cols = jnp.stack(cols, axis=2)
    cols = cols.transpose(0, 3, 4, 1, 2).reshape(B * Ho * Wo, Ci * k * k)
    wmat = w.reshape(Co, Ci * k * k).T
    y = jnp.dot(cols.astype(jnp.bfloat16), wmat.astype(jnp.bfloat16),
                preferred_element_type=jnp.float32) + b.reshape(1, Co)
    y = jnp.maximum(y, 0.0)
    return y.reshape(B, Ho, Wo, Co).transpose(0, 3, 1, 2)          # NCHW


def reference_forward(model, x, eps):
    f32, bf16 = jnp.float32, jnp.bfloat16
    B = x.shape[0]
    L = model.latent_dims
    h = _reference_conv(x, model.conv1_w, model.conv1_b)
    h = _reference_conv(h, model.conv2_w, model.conv2_b)
    enc = h.reshape(B, -1).astype(bf16)                            # NCHW flatten
    mu = jnp.dot(enc, model.mu_w.astype(bf16), preferred_element_type=f32) + model.mu_b
    lv = jnp.dot(enc, model.lv_w.astype(bf16), preferred_element_type=f32) + model.lv_b
    pose = jnp.dot(enc, model.pose_w.astype(bf16), preferred_element_type=f32) + model.pose_b
    z = eps * jnp.exp(0.5 * lv) + mu
    hz = jnp.dot(z.astype(bf16), model.dec1_w[:L].astype(bf16),
                 preferred_element_type=f32)
    if model.pose_channels == 1:
        hz = hz + pose * model.dec1_w[L:]
    else:
        hz = hz + jnp.dot(pose.astype(bf16), model.dec1_w[L:].astype(bf16),
                          preferred_element_type=f32)
    hz = jnp.maximum(hz + model.dec1_b.reshape(1, -1), 0.0)
    y = jnp.dot(hz.astype(bf16), model.dec2_w.astype(bf16),
                preferred_element_type=f32) + model.dec2_b.reshape(1, -1)
    x_rec = y.reshape(B, model.in_channels, model.img_size, model.img_size)
    return x_rec, z, pose, mu, lv


# ----------------------------------------------------------------------------
if __name__ == "__main__":
    key = jax.random.PRNGKey(0)
    k_param, k_x, k_eps = jax.random.split(key, 3)

    B, C, H, W = 2, 4, 16, 16
    x = jax.random.normal(k_x, (B, C, H, W), dtype=jnp.float32)

    model = AffinityVAEPallas(k_param, in_channels=C, img_size=H,
                              latent_dims=8, pose_channels=1)
    # TODO(synk): the PyTorch module samples eps internally (torch.randn_like);
    # here eps is an explicit input so the kernel and reference are comparable.
    eps = jax.random.normal(k_eps, (B, model.latent_dims), dtype=jnp.float32)

    outs = model(x, eps=eps)
    jax.block_until_ready(outs)
    x_rec, z, pose, mu, log_var = outs

    assert x_rec.shape == (B, C, H, W)
    assert z.shape == (B, 8) and mu.shape == (B, 8) and log_var.shape == (B, 8)
    assert pose.shape == (B, 1)
    assert bool(jnp.all(jnp.isfinite(x_rec)))

    # Check the fused kernel against a pure-JAX reference (same weights, same
    # eps, same bf16-matmul policy; tolerance covers bf16 rounding / f32
    # accumulation-order differences only).
    refs = reference_forward(model, x, eps)
    for got, want, name in zip(outs, refs, ("x_rec", "z", "pose", "mu", "log_var")):
        np.testing.assert_allclose(np.asarray(got), np.asarray(want),
                                   rtol=2e-2, atol=5e-3, err_msg=name)

    print("KERNEL_OK")
</pallas_src>

<mosaic_0001>
module attributes {stable_mosaic.version = 11 : i64} {
  func.func @_fused_vae_kernel(%arg0: memref<2x1024xbf16, #tpu.memory_space<vmem>>, %arg1: memref<2x8xf32, #tpu.memory_space<vmem>>, %arg2: memref<1024x512xbf16, #tpu.memory_space<vmem>>, %arg3: memref<1x512xf32, #tpu.memory_space<vmem>>, %arg4: memref<512x256xbf16, #tpu.memory_space<vmem>>, %arg5: memref<1x256xf32, #tpu.memory_space<vmem>>, %arg6: memref<256x17xbf16, #tpu.memory_space<vmem>>, %arg7: memref<1x17xf32, #tpu.memory_space<vmem>>, %arg8: memref<8x128xbf16, #tpu.memory_space<vmem>>, %arg9: memref<1x128xf32, #tpu.memory_space<vmem>>, %arg10: memref<1x128xf32, #tpu.memory_space<vmem>>, %arg11: memref<128x1024xbf16, #tpu.memory_space<vmem>>, %arg12: memref<1x1024xf32, #tpu.memory_space<vmem>>, %arg13: memref<2x1024xf32, #tpu.memory_space<vmem>>, %arg14: memref<2x8xf32, #tpu.memory_space<vmem>>, %arg15: memref<2x1xf32, #tpu.memory_space<vmem>>, %arg16: memref<2x8xf32, #tpu.memory_space<vmem>>, %arg17: memref<2x8xf32, #tpu.memory_space<vmem>>) attributes {dimension_semantics = [], scalar_prefetch = 0 : i64, scratch_operands = 0 : i64, tpu.core_type = #tpu.core_type<tc>} {
    %c0 = arith.constant 0 : index
    %c0_0 = arith.constant 0 : index
    %0 = vector.load %arg0[%c0, %c0_0] : memref<2x1024xbf16, #tpu.memory_space<vmem>>, vector<2x1024xbf16>
    %c0_1 = arith.constant 0 : index
    %c0_2 = arith.constant 0 : index
    %1 = vector.load %arg2[%c0_1, %c0_2] : memref<1024x512xbf16, #tpu.memory_space<vmem>>, vector<1024x512xbf16>
    %cst = arith.constant dense<0.000000e+00> : vector<2x512xf32>
    %2 = tpu.matmul %0, %1, %cst {dimension_numbers = #tpu.dot_dimension_numbers<[1], [0], [0], [1], [0, 0, 1, 1], [], []>} : vector<2x1024xbf16>, vector<1024x512xbf16>, vector<2x512xf32> -> vector<2x512xf32>
    %c0_3 = arith.constant 0 : index
    %c0_4 = arith.constant 0 : index
    %3 = vector.load %arg3[%c0_3, %c0_4] : memref<1x512xf32, #tpu.memory_space<vmem>>, vector<1x512xf32>
    %4 = vector.broadcast %3 : vector<1x512xf32> to vector<2x512xf32>
    %5 = arith.addf %2, %4 : vector<2x512xf32>
    %cst_5 = arith.constant 0.000000e+00 : f32
    %6 = vector.broadcast %cst_5 : f32 to vector<2x512xf32>
    %7 = arith.maximumf %5, %6 : vector<2x512xf32>
    %8 = arith.truncf %7 : vector<2x512xf32> to vector<2x512xbf16>
    %c0_6 = arith.constant 0 : index
    %c0_7 = arith.constant 0 : index
    %9 = vector.load %arg4[%c0_6, %c0_7] : memref<512x256xbf16, #tpu.memory_space<vmem>>, vector<512x256xbf16>
    %cst_8 = arith.constant dense<0.000000e+00> : vector<2x256xf32>
    %10 = tpu.matmul %8, %9, %cst_8 {dimension_numbers = #tpu.dot_dimension_numbers<[1], [0], [0], [1], [0, 0, 1, 1], [], []>} : vector<2x512xbf16>, vector<512x256xbf16>, vector<2x256xf32> -> vector<2x256xf32>
    %c0_9 = arith.constant 0 : index
    %c0_10 = arith.constant 0 : index
    %11 = vector.load %arg5[%c0_9, %c0_10] : memref<1x256xf32, #tpu.memory_space<vmem>>, vector<1x256xf32>
    %12 = vector.broadcast %11 : vector<1x256xf32> to vector<2x256xf32>
    %13 = arith.addf %10, %12 : vector<2x256xf32>
    %cst_11 = arith.constant 0.000000e+00 : f32
    %14 = vector.broadcast %cst_11 : f32 to vector<2x256xf32>
    %15 = arith.maximumf %13, %14 : vector<2x256xf32>
    %16 = arith.truncf %15 : vector<2x256xf32> to vector<2x256xbf16>
    %c0_12 = arith.constant 0 : index
    %c0_13 = arith.constant 0 : index
    %17 = vector.load %arg6[%c0_12, %c0_13] : memref<256x17xbf16, #tpu.memory_space<vmem>>, vector<256x17xbf16>
    %cst_14 = arith.constant dense<0.000000e+00> : vector<2x17xf32>
    %18 = tpu.matmul %16, %17, %cst_14 {dimension_numbers = #tpu.dot_dimension_numbers<[1], [0], [0], [1], [0, 0, 1, 1], [], []>} : vector<2x256xbf16>, vector<256x17xbf16>, vector<2x17xf32> -> vector<2x17xf32>
    %c0_15 = arith.constant 0 : index
    %c0_16 = arith.constant 0 : index
    %19 = vector.load %arg7[%c0_15, %c0_16] : memref<1x17xf32, #tpu.memory_space<vmem>>, vector<1x17xf32>
    %20 = vector.broadcast %19 : vector<1x17xf32> to vector<2x17xf32>
    %21 = arith.addf %18, %20 : vector<2x17xf32>
    %22 = vector.extract_strided_slice %21 {offsets = [0, 0], sizes = [2, 8], strides = [1, 1]} : vector<2x17xf32> to vector<2x8xf32>
    %23 = vector.extract_strided_slice %21 {offsets = [0, 8], sizes = [2, 8], strides = [1, 1]} : vector<2x17xf32> to vector<2x8xf32>
    %24 = vector.extract_strided_slice %21 {offsets = [0, 16], sizes = [2, 1], strides = [1, 1]} : vector<2x17xf32> to vector<2x1xf32>
    %c0_17 = arith.constant 0 : index
    %c0_18 = arith.constant 0 : index
    %25 = vector.load %arg1[%c0_17, %c0_18] : memref<2x8xf32, #tpu.memory_space<vmem>>, vector<2x8xf32>
    %cst_19 = arith.constant 5.000000e-01 : f32
    %26 = vector.broadcast %cst_19 : f32 to vector<2x8xf32>
    %27 = arith.mulf %26, %23 : vector<2x8xf32>
    %28 = math.exp %27 : vector<2x8xf32>
    %29 = arith.mulf %25, %28 : vector<2x8xf32>
    %30 = arith.addf %29, %22 : vector<2x8xf32>
    %31 = arith.truncf %30 : vector<2x8xf32> to vector<2x8xbf16>
    %c0_20 = arith.constant 0 : index
    %c0_21 = arith.constant 0 : index
    %32 = vector.load %arg8[%c0_20, %c0_21] : memref<8x128xbf16, #tpu.memory_space<vmem>>, vector<8x128xbf16>
    %cst_22 = arith.constant dense<0.000000e+00> : vector<2x128xf32>
    %33 = tpu.matmul %31, %32, %cst_22 {dimension_numbers = #tpu.dot_dimension_numbers<[1], [0], [0], [1], [0, 0, 1, 1], [], []>} : vector<2x8xbf16>, vector<8x128xbf16>, vector<2x128xf32> -> vector<2x128xf32>
    %c0_23 = arith.constant 0 : index
    %c0_24 = arith.constant 0 : index
    %34 = vector.load %arg9[%c0_23, %c0_24] : memref<1x128xf32, #tpu.memory_space<vmem>>, vector<1x128xf32>
    %35 = vector.broadcast %24 : vector<2x1xf32> to vector<2x128xf32>
    %36 = vector.broadcast %34 : vector<1x128xf32> to vector<2x128xf32>
    %37 = arith.mulf %35, %36 : vector<2x128xf32>
    %38 = arith.addf %33, %37 : vector<2x128xf32>
    %c0_25 = arith.constant 0 : index
    %c0_26 = arith.constant 0 : index
    %39 = vector.load %arg10[%c0_25, %c0_26] : memref<1x128xf32, #tpu.memory_space<vmem>>, vector<1x128xf32>
    %40 = vector.broadcast %39 : vector<1x128xf32> to vector<2x128xf32>
    %41 = arith.addf %38, %40 : vector<2x128xf32>
    %cst_27 = arith.constant 0.000000e+00 : f32
    %42 = vector.broadcast %cst_27 : f32 to vector<2x128xf32>
    %43 = arith.maximumf %41, %42 : vector<2x128xf32>
    %44 = arith.truncf %43 : vector<2x128xf32> to vector<2x128xbf16>
    %c0_28 = arith.constant 0 : index
    %c0_29 = arith.constant 0 : index
    %45 = vector.load %arg11[%c0_28, %c0_29] : memref<128x1024xbf16, #tpu.memory_space<vmem>>, vector<128x1024xbf16>
    %cst_30 = arith.constant dense<0.000000e+00> : vector<2x1024xf32>
    %46 = tpu.matmul %44, %45, %cst_30 {dimension_numbers = #tpu.dot_dimension_numbers<[1], [0], [0], [1], [0, 0, 1, 1], [], []>} : vector<2x128xbf16>, vector<128x1024xbf16>, vector<2x1024xf32> -> vector<2x1024xf32>
    %c0_31 = arith.constant 0 : index
    %c0_32 = arith.constant 0 : index
    %47 = vector.load %arg12[%c0_31, %c0_32] : memref<1x1024xf32, #tpu.memory_space<vmem>>, vector<1x1024xf32>
    %48 = vector.broadcast %47 : vector<1x1024xf32> to vector<2x1024xf32>
    %49 = arith.addf %46, %48 : vector<2x1024xf32>
    %c0_33 = arith.constant 0 : index
    %c0_34 = arith.constant 0 : index
    %50 = vector.load %arg13[%c0_33, %c0_34] : memref<2x1024xf32, #tpu.memory_space<vmem>>, vector<2x1024xf32>
    tpu.vector_store %arg13[%c0_33, %c0_34], %49 {strides = array<i32>} : memref<2x1024xf32, #tpu.memory_space<vmem>>, vector<2x1024xf32>,
    %c0_35 = arith.constant 0 : index
    %c0_36 = arith.constant 0 : index
    %51 = vector.load %arg14[%c0_35, %c0_36] : memref<2x8xf32, #tpu.memory_space<vmem>>, vector<2x8xf32>
    tpu.vector_store %arg14[%c0_35, %c0_36], %30 {strides = array<i32>} : memref<2x8xf32, #tpu.memory_space<vmem>>, vector<2x8xf32>,
    %c0_37 = arith.constant 0 : index
    %c0_38 = arith.constant 0 : index
    %52 = vector.load %arg15[%c0_37, %c0_38] : memref<2x1xf32, #tpu.memory_space<vmem>>, vector<2x1xf32>
    tpu.vector_store %arg15[%c0_37, %c0_38], %24 {strides = array<i32>} : memref<2x1xf32, #tpu.memory_space<vmem>>, vector<2x1xf32>,
    %c0_39 = arith.constant 0 : index
    %c0_40 = arith.constant 0 : index
    %53 = vector.load %arg16[%c0_39, %c0_40] : memref<2x8xf32, #tpu.memory_space<vmem>>, vector<2x8xf32>
    tpu.vector_store %arg16[%c0_39, %c0_40], %22 {strides = array<i32>} : memref<2x8xf32, #tpu.memory_space<vmem>>, vector<2x8xf32>,
    %c0_41 = arith.constant 0 : index
    %c0_42 = arith.constant 0 : index
    %54 = vector.load %arg17[%c0_41, %c0_42] : memref<2x8xf32, #tpu.memory_space<vmem>>, vector<2x8xf32>
    tpu.vector_store %arg17[%c0_41, %c0_42], %23 {strides = array<i32>} : memref<2x8xf32, #tpu.memory_space<vmem>>, vector<2x8xf32>,
    return
  }
}

</mosaic_0001>

<bundles_post_ra>
// kernel: _forward_impl.1
= control target key start
LH: loop header
LB: loop body
LE: loop exit
PB: predicated region body
PF: predicated region fallthrough
CT: control target
= control target key end

     0   :  { %s5950_s0 = inlined_call_operand.vmem [shape: bf16[2,1024], index: 0, kind: input, shape index: {}]   ;;  %s5951_s1 = inlined_call_operand.vmem [shape: f32[2,8], index: 1, kind: input, shape index: {}]   ;;  %s5952_s2 = inlined_call_operand.vmem [shape: bf16[1024,512], index: 2, kind: input, shape index: {}]   ;;  %s5953_s3 = inlined_call_operand.vmem [shape: f32[1,512], index: 3, kind: input, shape index: {}]   ;;  %s5954_s4 = inlined_call_operand.vmem [shape: bf16[512,256], index: 4, kind: input, shape index: {}]   ;;  %s5955_s5 = inlined_call_operand.vmem [shape: f32[1,256], index: 5, kind: input, shape index: {}]   ;;  %s5956_s6 = inlined_call_operand.vmem [shape: bf16[256,17], index: 6, kind: input, shape index: {}]   ;;  %s5957_s7 = inlined_call_operand.vmem [shape: f32[1,17], index: 7, kind: input, shape index: {}]   ;;  %s5958_s8 = inlined_call_operand.vmem [shape: bf16[8,128], index: 8, kind: input, shape index: {}]   ;;  %s5959_s9 = inlined_call_operand.vmem [shape: f32[1,128], index: 9, kind: input, shape index: {}]   ;;  %s5960_s10 = inlined_call_operand.vmem [shape: f32[1,128], index: 10, kind: input, shape index: {}]   ;;  %s5961_s11 = inlined_call_operand.vmem [shape: bf16[128,1024], index: 11, kind: input, shape index: {}]   ;;  %s5962_s12 = inlined_call_operand.vmem [shape: f32[1,1024], index: 12, kind: input, shape index: {}]   ;;  %s5963_s13 = inlined_call_operand.vmem [shape: f32[2,1024], index: 13, kind: output, shape index: {0}]   ;;  %s5964_s14 = inlined_call_operand.hbm [shape: f32[2,8], index: 14, kind: output, shape index: {1}]   ;;  %s5965_s15 = inlined_call_operand.vmem [shape: f32[2,1], index: 15, kind: output, shape index: {2}]   ;;  %s5966_s16 = inlined_call_operand.hbm [shape: f32[2,8], index: 16, kind: output, shape index: {3}]   ;;  %s5967_s17 = inlined_call_operand.hbm [shape: f32[2,8], index: 17, kind: output, shape index: {4}]  }
   0x1   :  { %5968 = sst [smem:[#allocation9_spill]] %s5950_s0 }
   0x2   :  { %5969 = sst [smem:[#allocation10_spill]] %s5951_s1 }
   0x3   :  { %23 = vsyncpa [#allocation3], 0  ;;  %v3922_v0 = vld [vmem:[%s5952_s2 + $0x4] ss:$16 sps:$4 sm:$0xff]   ;;  %v3924_v1 = vld [vmem:[%s5952_s2 + $0xc] ss:$16 sps:$4 sm:$0xff]   ;;  %v311_v36 = vlaneseq }
   0x4   :  { %1669 = vmatprep.subr.bf16.mxu0 %v3922_v0  ;;  %v3926_v2 = vld [vmem:[%s5952_s2] ss:$16 sps:$4 sm:$0xff]   ;;  %v3927_v3 = vld [vmem:[%s5952_s2 + $0x8] ss:$16 sps:$4 sm:$0xff]   ;;  %1833 = vmatprep.subr.bf16.mxu1 %v3924_v1  ;;  %v3928_v4 = vld [vmem:[%s5952_s2 + $0x24] ss:$16 sps:$4 sm:$0xff]  }
   0x5   :  { %1670 = vmatpush1.bf16.msra.mxu0 %v3926_v2  ;;  %1834 = vmatpush1.bf16.msra.mxu1 %v3927_v3  ;;  %v3930_v5 = vld [vmem:[%s5952_s2 + $0x2c] ss:$16 sps:$4 sm:$0xff]   ;;  %v3932_v6 = vld [vmem:[%s5952_s2 + $0x20] ss:$16 sps:$4 sm:$0xff]   ;;  %v3933_v7 = vld [vmem:[%s5952_s2 + $0x28] ss:$16 sps:$4 sm:$0xff]  }
   0x6   :  { %1671 = vmatprep.subr.bf16.mxu0 %v3928_v4  ;;  %1835 = vmatprep.subr.bf16.mxu1 %v3930_v5  ;;  %v3934_v8 = vld [vmem:[%s5952_s2 + $0x44] ss:$16 sps:$4 sm:$0xff]   ;;  %v3936_v9 = vld [vmem:[%s5952_s2 + $0x4c] ss:$16 sps:$4 sm:$0xff]   ;;  %v3938_v10 = vld [vmem:[%s5952_s2 + $0x40] ss:$16 sps:$4 sm:$0xff]  }
   0x7   :  { %v3939_v11 = vld [vmem:[%s5952_s2 + $0x48] ss:$16 sps:$4 sm:$0xff]   ;;  %v3940_v12 = vld [vmem:[%s5952_s2 + $0x64] ss:$16 sps:$4 sm:$0xff]   ;;  %v3942_v13 = vld [vmem:[%s5952_s2 + $0x6c] ss:$16 sps:$4 sm:$0xff]  }
   0x8   :  { %v3944_v14 = vld [vmem:[%s5952_s2 + $0x60] ss:$16 sps:$4 sm:$0xff]   ;;  %v3945_v15 = vld [vmem:[%s5952_s2 + $0x68] ss:$16 sps:$4 sm:$0xff]   ;;  %v3946_v16 = vld [vmem:[%s5952_s2 + $0x84] ss:$16 sps:$4 sm:$0xff]  }
   0x9   :  { %1672 = vmatpush1.bf16.msra.mxu0 %v3932_v6  ;;  %1836 = vmatpush1.bf16.msra.mxu1 %v3933_v7  ;;  %v3948_v17 = vld [vmem:[%s5952_s2 + $0x8c] ss:$16 sps:$4 sm:$0xff]   ;;  %v3950_v18 = vld [vmem:[%s5952_s2 + $0x80] ss:$16 sps:$4 sm:$0xff]   ;;  %v3951_v19 = vld [vmem:[%s5952_s2 + $0x88] ss:$16 sps:$4 sm:$0xff]  }
   0xa   :  { %1673 = vmatprep.subr.bf16.mxu0 %v3934_v8  ;;  %1837 = vmatprep.subr.bf16.mxu1 %v3936_v9  ;;  %v3952_v20 = vld [vmem:[%s5952_s2 + $0xa4] ss:$16 sps:$4 sm:$0xff]   ;;  %v3954_v21 = vld [vmem:[%s5952_s2 + $0xac] ss:$16 sps:$4 sm:$0xff]   ;;  %v3956_v22 = vld [vmem:[%s5952_s2 + $0xa0] ss:$16 sps:$4 sm:$0xff]  }
   0xb   :  { %v3957_v23 = vld [vmem:[%s5952_s2 + $0xa8] ss:$16 sps:$4 sm:$0xff]   ;;  %v3958_v24 = vld [vmem:[%s5952_s2 + $0xc4] ss:$16 sps:$4 sm:$0xff]   ;;  %v3960_v25 = vld [vmem:[%s5952_s2 + $0xcc] ss:$16 sps:$4 sm:$0xff]  }
   0xc   :  { %v3962_v26 = vld [vmem:[%s5952_s2 + $0xc0] ss:$16 sps:$4 sm:$0xff]   ;;  %v3963_v27 = vld [vmem:[%s5952_s2 + $0xc8] ss:$16 sps:$4 sm:$0xff]   ;;  %v3964_v28 = vld [vmem:[%s5952_s2 + $0xe4] ss:$16 sps:$4 sm:$0xff]  }
   0xd   :  { %1674 = vmatpush1.bf16.msra.mxu0 %v3938_v10  ;;  %1838 = vmatpush1.bf16.msra.mxu1 %v3939_v11  ;;  %v3966_v29 = vld [vmem:[%s5952_s2 + $0xec] ss:$16 sps:$4 sm:$0xff]   ;;  %v3968_v30 = vld [vmem:[%s5952_s2 + $0xe0] ss:$16 sps:$4 sm:$0xff]   ;;  %v3969_v31 = vld [vmem:[%s5952_s2 + $0xe8] ss:$16 sps:$4 sm:$0xff]  }
   0xe   :  { %1675 = vmatprep.subr.bf16.mxu0 %v3940_v12  ;;  %1839 = vmatprep.subr.bf16.mxu1 %v3942_v13  ;;  %v3970_v32 = vld [vmem:[%s5952_s2 + $0x104] ss:$16 sps:$4 sm:$0xff]   ;;  %v3972_v33 = vld [vmem:[%s5952_s2 + $0x10c] ss:$16 sps:$4 sm:$0xff]   ;;  %v3974_v34 = vld [vmem:[%s5952_s2 + $0x100] ss:$16 sps:$4 sm:$0xff]  }
   0xf   :  { %v3975_v35 = vld [vmem:[%s5952_s2 + $0x108] ss:$16 sps:$4 sm:$0xff]   ;;  %v4491_v37 = vmov 1966171168   ;;  %v3976_v39 = vld [vmem:[%s5952_s2 + $0x124] ss:$16 sps:$4 sm:$0xff]  }
  0x10   :  { %v334_v38 = vunpack.c.l.s4 %v4491_v37  ;;  %v3978_v40 = vld [vmem:[%s5952_s2 + $0x12c] ss:$16 sps:$4 sm:$0xff]   ;;  %v3980_v41 = vld [vmem:[%s5952_s2 + $0x120] ss:$16 sps:$4 sm:$0xff]   ;;  %v4709_v42 = vshrl.u32 %v311_v36, 7  ;;  %s5970_s28 = sld [smem:[#allocation9_spill]] }
  0x11   :  { %1676 = vmatpush1.bf16.msra.mxu0 %v3944_v14  ;;  %1840 = vmatpush1.bf16.msra.mxu1 %v3945_v15  ;;  %v3981_v44 = vld [vmem:[%s5952_s2 + $0x128] ss:$16 sps:$4 sm:$0xff]   ;;  %v3982_v45 = vld [vmem:[%s5952_s2 + $0x144] ss:$16 sps:$4 sm:$0xff]   ;;  %v3984_v46 = vld [vmem:[%s5952_s2 + $0x14c] ss:$16 sps:$4 sm:$0xff]  }
  0x12   :  { %1677 = vmatprep.subr.bf16.mxu0 %v3946_v16  ;;  %1841 = vmatprep.subr.bf16.mxu1 %v3948_v17  ;;  %v335_v43 = vunpack.c.0.s8 %v334_v38  ;;  %v3986_v47 = vld [vmem:[%s5952_s2 + $0x140] ss:$16 sps:$4 sm:$0xff]   ;;  %v3987_v48 = vld [vmem:[%s5952_s2 + $0x148] ss:$16 sps:$4 sm:$0xff]   ;;  %v3988_v50 = vld [vmem:[%s5952_s2 + $0x164] ss:$16 sps:$4 sm:$0xff]  }
  0x13   :  { %v3990_v51 = vld [vmem:[%s5952_s2 + $0x16c] ss:$16 sps:$4 sm:$0xff]   ;;  %v3992_v53 = vld [vmem:[%s5952_s2 + $0x160] ss:$16 sps:$4 sm:$0xff]   ;;  %v3993_v55 = vld [vmem:[%s5952_s2 + $0x168] ss:$16 sps:$4 sm:$0xff]  }
  0x14   :  { %v4727_v49 = vsub.s32 %v335_v43, %v4709_v42  ;;  %v3994_v56 = vld [vmem:[%s5952_s2 + $0x184] ss:$16 sps:$4 sm:$0xff]   ;;  %v3996_v57 = vld [vmem:[%s5952_s2 + $0x18c] ss:$16 sps:$4 sm:$0xff]   ;;  %v3998_v59 = vld [vmem:[%s5952_s2 + $0x180] ss:$16 sps:$4 sm:$0xff]  }
  0x15   :  { %1678 = vmatpush1.bf16.msra.mxu0 %v3950_v18  ;;  %1842 = vmatpush1.bf16.msra.mxu1 %v3951_v19  ;;  %v3999_v61 = vld [vmem:[%s5952_s2 + $0x188] ss:$16 sps:$4 sm:$0xff]   ;;  %v4000_v62 = vld [vmem:[%s5952_s2 + $0x1a4] ss:$16 sps:$4 sm:$0xff]   ;;  %v4002_v63 = vld [vmem:[%s5952_s2 + $0x1ac] ss:$16 sps:$4 sm:$0xff]  }
  0x16   :  { %1679 = vmatprep.subr.bf16.mxu0 %v3952_v20  ;;  %1843 = vmatprep.subr.bf16.mxu1 %v3954_v21  ;;  %v52_v52 = vld [vmem:[%s5970_s28] sm:$0xff]  ;;  %v4005_v1 = vld [vmem:[%s5952_s2 + $0x1a8] ss:$16 sps:$4 sm:$0xff]   ;;  %v4008_v3 = vld [vmem:[%s5952_s2 + $0x1cc] ss:$16 sps:$4 sm:$0xff]  }
  0x17   :  { %v339_v54 = vrot.slane %v52_v52, %v4727_v49  ;;  %v4004_v0 = vld [vmem:[%s5952_s2 + $0x1a0] ss:$16 sps:$4 sm:$0xff]   ;;  %v4006_v2 = vld [vmem:[%s5952_s2 + $0x1c4] ss:$16 sps:$4 sm:$0xff]   ;;  %v4011_v5 = vld [vmem:[%s5952_s2 + $0x1c8] ss:$16 sps:$4 sm:$0xff]   ;;  %v332_v9 = vcombine.high %v52_v52, %v52_v52 }
  0x18   :  { %v4010_v4 = vld [vmem:[%s5952_s2 + $0x1c0] ss:$16 sps:$4 sm:$0xff]   ;;  %v4012_v6 = vld [vmem:[%s5952_s2 + $0x1e4] ss:$16 sps:$4 sm:$0xff]   ;;  %v4014_v7 = vld [vmem:[%s5952_s2 + $0x1ec] ss:$16 sps:$4 sm:$0xff]  }
  0x19   :  { %1680 = vmatpush1.bf16.msra.mxu0 %v3956_v22  ;;  %1844 = vmatpush1.bf16.msra.mxu1 %v3957_v23  ;;  %v347_v58 = vcombine.high %v339_v54, %v339_v54  ;;  %v4016_v8 = vld [vmem:[%s5952_s2 + $0x1e0] ss:$16 sps:$4 sm:$0xff]   ;;  %v4017_v10 = vld [vmem:[%s5952_s2 + $0x1e8] ss:$16 sps:$4 sm:$0xff]   ;;  %v4020_v11 = vld [vmem:[%s5952_s2 + $0x204] ss:$16 sps:$4 sm:$0xff]   ;;  %v346_v13 = vrot.slane %v332_v9, %v4727_v49  ;;  %v4805_v15 = vrot.slane %v339_v54, %v4727_v49 }
  0x1a   :  { %1681 = vmatprep.subr.bf16.mxu0 %v3958_v24  ;;  %1845 = vmatprep.subr.bf16.mxu1 %v3960_v25  ;;  %v4023_v12 = vld [vmem:[%s5952_s2 + $0x20c] ss:$16 sps:$4 sm:$0xff]   ;;  %v4018_v14 = vld [vmem:[%s5952_s2 + $0x200] ss:$16 sps:$4 sm:$0xff]   ;;  %v4021_v17 = vld [vmem:[%s5952_s2 + $0x208] ss:$16 sps:$4 sm:$0xff]  }
  0x1b   :  { %v369_v60 = vrot.slane %v347_v58, %v4727_v49  ;;  %v348_v16 = vcombine.high %v346_v13, %v346_v13  ;;  %v4026_v18 = vld [vmem:[%s5952_s2 + $0x224] ss:$16 sps:$4 sm:$0xff]   ;;  %v4029_v19 = vld [vmem:[%s5952_s2 + $0x22c] ss:$16 sps:$4 sm:$0xff]   ;;  %v4820_v21 = vrot.slane %v346_v13, %v4727_v49  ;;  %v4024_v23 = vld [vmem:[%s5952_s2 + $0x220] ss:$16 sps:$4 sm:$0xff]  }
  0x1c   :  { %v4027_v24 = vld [vmem:[%s5952_s2 + $0x228] ss:$16 sps:$4 sm:$0xff]   ;;  %v4032_v25 = vld [vmem:[%s5952_s2 + $0x244] ss:$16 sps:$4 sm:$0xff]   ;;  %v4053_v38 = vld [vmem:[%s5952_s2 + $0x2ac] ss:$16 sps:$4 sm:$0xff]  }
  0x1d   :  { %1682 = vmatpush1.bf16.msra.mxu0 %v3962_v26  ;;  %1846 = vmatpush1.bf16.msra.mxu1 %v3963_v27  ;;  %v4817_v20 = vrot.slane %v348_v16, %v4727_v49  ;;  %v379_v22 = vcombine.high %v369_v60, %v369_v60  ;;  %v4035_v26 = vld [vmem:[%s5952_s2 + $0x24c] ss:$16 sps:$4 sm:$0xff]   ;;  %v4030_v27 = vld [vmem:[%s5952_s2 + $0x240] ss:$16 sps:$4 sm:$0xff]   ;;  %v4045_v36 = vld [vmem:[%s5952_s2 + $0x288] ss:$16 sps:$4 sm:$0xff]  }
  0x1e   :  { %1683 = vmatprep.subr.bf16.mxu0 %v3964_v28  ;;  %1847 = vmatprep.subr.bf16.mxu1 %v3966_v29  ;;  %v4033_v28 = vld [vmem:[%s5952_s2 + $0x248] ss:$16 sps:$4 sm:$0xff]   ;;  %v4038_v29 = vld [vmem:[%s5952_s2 + $0x264] ss:$16 sps:$4 sm:$0xff]   ;;  %v4059_v43 = vld [vmem:[%s5952_s2 + $0x2cc] ss:$16 sps:$4 sm:$0xff]  }
  0x1f   :  { %1701 = vmatprep.mubr.bf16.mxu0 %v369_v60  ;;  %1865 = vmatprep.mubr.bf16.mxu1 %v369_v60  ;;  %v4050_v37 = vld [vmem:[%s5952_s2 + $0x2a4] ss:$16 sps:$4 sm:$0xff]   ;;  %v4063_v49 = vld [vmem:[%s5952_s2 + $0x2e8] ss:$16 sps:$4 sm:$0xff]   ;;  %v4066_v52 = vld [vmem:[%s5952_s2 + $0x300] ss:$16 sps:$4 sm:$0xff]  }
  0x20   :  { %v4074_v54 = vld [vmem:[%s5952_s2 + $0x324] ss:$16 sps:$4 sm:$0xff]   ;;  %v4078_v60 = vld [vmem:[%s5952_s2 + $0x340] ss:$16 sps:$4 sm:$0xff]   ;;  %v4099_v9 = vld [vmem:[%s5952_s2 + $0x3a8] ss:$16 sps:$4 sm:$0xff]  }
  0x21   :  { %1684 = vmatpush1.bf16.msra.mxu0 %v3968_v30  ;;  %1848 = vmatpush1.bf16.msra.mxu1 %v3969_v31  ;;  %v4041_v30 = vld [vmem:[%s5952_s2 + $0x26c] ss:$16 sps:$4 sm:$0xff]   ;;  %v4036_v31 = vld [vmem:[%s5952_s2 + $0x260] ss:$16 sps:$4 sm:$0xff]   ;;  %v4080_v58 = vld [vmem:[%s5952_s2 + $0x344] ss:$16 sps:$4 sm:$0xff]  }
  0x22   :  { %1685 = vmatprep.subr.bf16.mxu0 %v3970_v32  ;;  %1849 = vmatprep.subr.bf16.mxu1 %v3972_v33  ;;  %v4039_v32 = vld [vmem:[%s5952_s2 + $0x268] ss:$16 sps:$4 sm:$0xff]   ;;  %v4044_v33 = vld [vmem:[%s5952_s2 + $0x284] ss:$16 sps:$4 sm:$0xff]   ;;  %v4113_v16 = vld [vmem:[%s5952_s2 + $0x3ec] ss:$16 sps:$4 sm:$0xff]  }
  0x23   :  { %v4105_v13 = vld [vmem:[%s5952_s2 + $0x3c8] ss:$16 sps:$4 sm:$0xff]  }
  0x25   :  { %1686 = vmatpush1.bf16.msra.mxu0 %v3974_v34  ;;  %1850 = vmatpush1.bf16.msra.mxu1 %v3975_v35  ;;  %v4047_v34 = vld [vmem:[%s5952_s2 + $0x28c] ss:$16 sps:$4 sm:$0xff]   ;;  %v4042_v35 = vld [vmem:[%s5952_s2 + $0x280] ss:$16 sps:$4 sm:$0xff]  }
  0x26   :  { %1687 = vmatprep.subr.bf16.mxu0 %v3976_v39  ;;  %1851 = vmatprep.subr.bf16.mxu1 %v3978_v40  ;;  %v4048_v39 = vld [vmem:[%s5952_s2 + $0x2a0] ss:$16 sps:$4 sm:$0xff]   ;;  %v4051_v40 = vld [vmem:[%s5952_s2 + $0x2a8] ss:$16 sps:$4 sm:$0xff]  }
  0x29   :  { %1688 = vmatpush1.bf16.msra.mxu0 %v3980_v41  ;;  %1852 = vmatpush1.bf16.msra.mxu1 %v3981_v44  ;;  %v4056_v41 = vld [vmem:[%s5952_s2 + $0x2c4] ss:$16 sps:$4 sm:$0xff]   ;;  %v4054_v44 = vld [vmem:[%s5952_s2 + $0x2c0] ss:$16 sps:$4 sm:$0xff]  }
  0x2a   :  { %1689 = vmatprep.subr.bf16.mxu0 %v3982_v45  ;;  %1853 = vmatprep.subr.bf16.mxu1 %v3984_v46  ;;  %v4057_v45 = vld [vmem:[%s5952_s2 + $0x2c8] ss:$16 sps:$4 sm:$0xff]   ;;  %v4062_v46 = vld [vmem:[%s5952_s2 + $0x2e4] ss:$16 sps:$4 sm:$0xff]  }
  0x2d   :  { %1690 = vmatpush1.bf16.msra.mxu0 %v3986_v47  ;;  %1854 = vmatpush1.bf16.msra.mxu1 %v3987_v48  ;;  %v4065_v47 = vld [vmem:[%s5952_s2 + $0x2ec] ss:$16 sps:$4 sm:$0xff]   ;;  %v4060_v48 = vld [vmem:[%s5952_s2 + $0x2e0] ss:$16 sps:$4 sm:$0xff]  }
  0x2e   :  { %1691 = vmatprep.subr.bf16.mxu0 %v3988_v50  ;;  %1855 = vmatprep.subr.bf16.mxu1 %v3990_v51  ;;  %v4068_v50 = vld [vmem:[%s5952_s2 + $0x304] ss:$16 sps:$4 sm:$0xff]   ;;  %v4071_v51 = vld [vmem:[%s5952_s2 + $0x30c] ss:$16 sps:$4 sm:$0xff]  }
  0x31   :  { %1692 = vmatpush1.bf16.msra.mxu0 %v3992_v53  ;;  %1856 = vmatpush1.bf16.msra.mxu1 %v3993_v55  ;;  %v4069_v53 = vld [vmem:[%s5952_s2 + $0x308] ss:$16 sps:$4 sm:$0xff]   ;;  %v4077_v55 = vld [vmem:[%s5952_s2 + $0x32c] ss:$16 sps:$4 sm:$0xff]  }
  0x32   :  { %1693 = vmatprep.subr.bf16.mxu0 %v3994_v56  ;;  %1857 = vmatprep.subr.bf16.mxu1 %v3996_v57  ;;  %v4072_v56 = vld [vmem:[%s5952_s2 + $0x320] ss:$16 sps:$4 sm:$0xff]   ;;  %v4075_v57 = vld [vmem:[%s5952_s2 + $0x328] ss:$16 sps:$4 sm:$0xff]  }
  0x35   :  { %1694 = vmatpush1.bf16.msra.mxu0 %v3998_v59  ;;  %1858 = vmatpush1.bf16.msra.mxu1 %v3999_v61  ;;  %v4083_v59 = vld [vmem:[%s5952_s2 + $0x34c] ss:$16 sps:$4 sm:$0xff]   ;;  %v4081_v61 = vld [vmem:[%s5952_s2 + $0x348] ss:$16 sps:$4 sm:$0xff]  }
  0x36   :  { %1695 = vmatprep.subr.bf16.mxu0 %v4000_v62  ;;  %1859 = vmatprep.subr.bf16.mxu1 %v4002_v63  ;;  %v4086_v62 = vld [vmem:[%s5952_s2 + $0x364] ss:$16 sps:$4 sm:$0xff]   ;;  %v4089_v63 = vld [vmem:[%s5952_s2 + $0x36c] ss:$16 sps:$4 sm:$0xff]  }
  0x39   :  { %1696 = vmatpush1.bf16.msra.mxu0 %v4004_v0  ;;  %1860 = vmatpush1.bf16.msra.mxu1 %v4005_v1  ;;  %v4084_v0 = vld [vmem:[%s5952_s2 + $0x360] ss:$16 sps:$4 sm:$0xff]   ;;  %v4087_v1 = vld [vmem:[%s5952_s2 + $0x368] ss:$16 sps:$4 sm:$0xff]  }
  0x3a   :  { %1697 = vmatprep.subr.bf16.mxu0 %v4006_v2  ;;  %1861 = vmatprep.subr.bf16.mxu1 %v4008_v3  ;;  %v4092_v2 = vld [vmem:[%s5952_s2 + $0x384] ss:$16 sps:$4 sm:$0xff]   ;;  %v4095_v3 = vld [vmem:[%s5952_s2 + $0x38c] ss:$16 sps:$4 sm:$0xff]  }
  0x3d   :  { %1698 = vmatpush1.bf16.msra.mxu0 %v4010_v4  ;;  %1862 = vmatpush1.bf16.msra.mxu1 %v4011_v5  ;;  %v4090_v4 = vld [vmem:[%s5952_s2 + $0x380] ss:$16 sps:$4 sm:$0xff]   ;;  %v4093_v5 = vld [vmem:[%s5952_s2 + $0x388] ss:$16 sps:$4 sm:$0xff]  }
  0x3e   :  { %1699 = vmatprep.subr.bf16.mxu0 %v4012_v6  ;;  %1863 = vmatprep.subr.bf16.mxu1 %v4014_v7  ;;  %v4098_v6 = vld [vmem:[%s5952_s2 + $0x3a4] ss:$16 sps:$4 sm:$0xff]   ;;  %v4101_v7 = vld [vmem:[%s5952_s2 + $0x3ac] ss:$16 sps:$4 sm:$0xff]  }
  0x41   :  { %1700 = vmatpush1.bf16.msra.mxu0 %v4016_v8  ;;  %1864 = vmatpush1.bf16.msra.mxu1 %v4017_v10  ;;  %v4096_v8 = vld [vmem:[%s5952_s2 + $0x3a0] ss:$16 sps:$4 sm:$0xff]   ;;  %v4104_v10 = vld [vmem:[%s5952_s2 + $0x3c4] ss:$16 sps:$4 sm:$0xff]  }
  0x42   :  { %1710 = vmatprep.subr.bf16.mxu0 %v4020_v11  ;;  %1874 = vmatprep.subr.bf16.mxu1 %v4023_v12  ;;  %v4107_v11 = vld [vmem:[%s5952_s2 + $0x3cc] ss:$16 sps:$4 sm:$0xff]   ;;  %v4102_v12 = vld [vmem:[%s5952_s2 + $0x3c0] ss:$16 sps:$4 sm:$0xff]  }
  0x44   :  { %1702 = vmatmul.mubr.bf16.vlgmr.msra.gmra.mrb[0].mxu0 %v4805_v15  ;;  %1866 = vmatmul.mubr.bf16.vlgmr.msra.gmra.mrb[0].mxu1 %v4805_v15 }
  0x45   :  { %1711 = vmatpush1.bf16.msra.mxu0 %v4018_v14  ;;  %1875 = vmatpush1.bf16.msra.mxu1 %v4021_v17  ;;  %v4110_v14 = vld [vmem:[%s5952_s2 + $0x3e4] ss:$16 sps:$4 sm:$0xff]   ;;  %v4108_v17 = vld [vmem:[%s5952_s2 + $0x3e0] ss:$16 sps:$4 sm:$0xff]  }
  0x46   :  { %1712 = vmatprep.subr.bf16.mxu0 %v4026_v18  ;;  %1876 = vmatprep.subr.bf16.mxu1 %v4029_v19  ;;  %v4111_v18 = vld [vmem:[%s5952_s2 + $0x3e8] ss:$16 sps:$4 sm:$0xff]   ;;  %v4116_v19 = vld [vmem:[%s5952_s2 + $0x404] ss:$16 sps:$4 sm:$0xff]  }
  0x47   :  { %1742 = vmatprep.mubr.bf16.mxu0 %v379_v22  ;;  %1906 = vmatprep.mubr.bf16.mxu1 %v379_v22  ;;  %v4119_v22 = vld [vmem:[%s5952_s2 + $0x40c] ss:$16 sps:$4 sm:$0xff]  }
  0x49   :  { %1713 = vmatpush1.bf16.msra.mxu0 %v4024_v23  ;;  %1877 = vmatpush1.bf16.msra.mxu1 %v4027_v24  ;;  %v4114_v23 = vld [vmem:[%s5952_s2 + $0x400] ss:$16 sps:$4 sm:$0xff]   ;;  %v377_v24 = vcombine.high %v4805_v15, %v4805_v15 }
  0x4a   :  { %1714 = vmatprep.subr.bf16.mxu0 %v4032_v25  ;;  %1878 = vmatprep.subr.bf16.mxu1 %v4035_v26  ;;  %v4117_v25 = vld [vmem:[%s5952_s2 + $0x408] ss:$16 sps:$4 sm:$0xff]   ;;  %v4122_v26 = vld [vmem:[%s5952_s2 + $0x424] ss:$16 sps:$4 sm:$0xff]   ;;  %v4120_v15 = vld [vmem:[%s5952_s2 + $0x420] ss:$16 sps:$4 sm:$0xff]  }
  0x4d   :  { %1715 = vmatpush1.bf16.msra.mxu0 %v4030_v27  ;;  %1879 = vmatpush1.bf16.msra.mxu1 %v4033_v28  ;;  %v4125_v27 = vld [vmem:[%s5952_s2 + $0x42c] ss:$16 sps:$4 sm:$0xff]   ;;  %v4123_v28 = vld [vmem:[%s5952_s2 + $0x428] ss:$16 sps:$4 sm:$0xff]  }
  0x4e   :  { %1716 = vmatprep.subr.bf16.mxu0 %v4038_v29  ;;  %1880 = vmatprep.subr.bf16.mxu1 %v4041_v30  ;;  %v4128_v29 = vld [vmem:[%s5952_s2 + $0x444] ss:$16 sps:$4 sm:$0xff]   ;;  %v4131_v30 = vld [vmem:[%s5952_s2 + $0x44c] ss:$16 sps:$4 sm:$0xff]  }
  0x51   :  { %1717 = vmatpush1.bf16.msra.mxu0 %v4036_v31  ;;  %1881 = vmatpush1.bf16.msra.mxu1 %v4039_v32  ;;  %v4126_v31 = vld [vmem:[%s5952_s2 + $0x440] ss:$16 sps:$4 sm:$0xff]   ;;  %v4129_v32 = vld [vmem:[%s5952_s2 + $0x448] ss:$16 sps:$4 sm:$0xff]  }
  0x52   :  { %1718 = vmatprep.subr.bf16.mxu0 %v4044_v33  ;;  %1882 = vmatprep.subr.bf16.mxu1 %v4047_v34  ;;  %v4134_v33 = vld [vmem:[%s5952_s2 + $0x464] ss:$16 sps:$4 sm:$0xff]   ;;  %v4137_v34 = vld [vmem:[%s5952_s2 + $0x46c] ss:$16 sps:$4 sm:$0xff]  }
  0x55   :  { %1719 = vmatpush1.bf16.msra.mxu0 %v4042_v35  ;;  %1883 = vmatpush1.bf16.msra.mxu1 %v4045_v36  ;;  %v4132_v35 = vld [vmem:[%s5952_s2 + $0x460] ss:$16 sps:$4 sm:$0xff]   ;;  %v4135_v36 = vld [vmem:[%s5952_s2 + $0x468] ss:$16 sps:$4 sm:$0xff]  }
  0x56   :  { %1720 = vmatprep.subr.bf16.mxu0 %v4050_v37  ;;  %1884 = vmatprep.subr.bf16.mxu1 %v4053_v38  ;;  %v4140_v37 = vld [vmem:[%s5952_s2 + $0x484] ss:$16 sps:$4 sm:$0xff]   ;;  %v4143_v38 = vld [vmem:[%s5952_s2 + $0x48c] ss:$16 sps:$4 sm:$0xff]  }
  0x59   :  { %1721 = vmatpush1.bf16.msra.mxu0 %v4048_v39  ;;  %1885 = vmatpush1.bf16.msra.mxu1 %v4051_v40  ;;  %v4138_v39 = vld [vmem:[%s5952_s2 + $0x480] ss:$16 sps:$4 sm:$0xff]   ;;  %v4141_v40 = vld [vmem:[%s5952_s2 + $0x488] ss:$16 sps:$4 sm:$0xff]  }
  0x5a   :  { %1722 = vmatprep.subr.bf16.mxu0 %v4056_v41  ;;  %1886 = vmatprep.subr.bf16.mxu1 %v4059_v43  ;;  %v4146_v41 = vld [vmem:[%s5952_s2 + $0x4a4] ss:$16 sps:$4 sm:$0xff]   ;;  %v4149_v43 = vld [vmem:[%s5952_s2 + $0x4ac] ss:$16 sps:$4 sm:$0xff]  }
  0x5d   :  { %1723 = vmatpush1.bf16.msra.mxu0 %v4054_v44  ;;  %1887 = vmatpush1.bf16.msra.mxu1 %v4057_v45  ;;  %v4144_v44 = vld [vmem:[%s5952_s2 + $0x4a0] ss:$16 sps:$4 sm:$0xff]   ;;  %v4147_v45 = vld [vmem:[%s5952_s2 + $0x4a8] ss:$16 sps:$4 sm:$0xff]  }
  0x5e   :  { %1724 = vmatprep.subr.bf16.mxu0 %v4062_v46  ;;  %1888 = vmatprep.subr.bf16.mxu1 %v4065_v47  ;;  %v4152_v46 = vld [vmem:[%s5952_s2 + $0x4c4] ss:$16 sps:$4 sm:$0xff]   ;;  %v4155_v47 = vld [vmem:[%s5952_s2 + $0x4cc] ss:$16 sps:$4 sm:$0xff]  }
  0x61   :  { %1725 = vmatpush1.bf16.msra.mxu0 %v4060_v48  ;;  %1889 = vmatpush1.bf16.msra.mxu1 %v4063_v49  ;;  %v4150_v48 = vld [vmem:[%s5952_s2 + $0x4c0] ss:$16 sps:$4 sm:$0xff]   ;;  %v4153_v49 = vld [vmem:[%s5952_s2 + $0x4c8] ss:$16 sps:$4 sm:$0xff]  }
  0x62   :  { %1726 = vmatprep.subr.bf16.mxu0 %v4068_v50  ;;  %1890 = vmatprep.subr.bf16.mxu1 %v4071_v51  ;;  %v4158_v50 = vld [vmem:[%s5952_s2 + $0x4e4] ss:$16 sps:$4 sm:$0xff]   ;;  %v4161_v51 = vld [vmem:[%s5952_s2 + $0x4ec] ss:$16 sps:$4 sm:$0xff]  }
  0x65   :  { %1727 = vmatpush1.bf16.msra.mxu0 %v4066_v52  ;;  %1891 = vmatpush1.bf16.msra.mxu1 %v4069_v53  ;;  %v4156_v52 = vld [vmem:[%s5952_s2 + $0x4e0] ss:$16 sps:$4 sm:$0xff]   ;;  %v4159_v53 = vld [vmem:[%s5952_s2 + $0x4e8] ss:$16 sps:$4 sm:$0xff]  }
  0x66   :  { %1728 = vmatprep.subr.bf16.mxu0 %v4074_v54  ;;  %1892 = vmatprep.subr.bf16.mxu1 %v4077_v55  ;;  %v4164_v54 = vld [vmem:[%s5952_s2 + $0x504] ss:$16 sps:$4 sm:$0xff]   ;;  %v4167_v55 = vld [vmem:[%s5952_s2 + $0x50c] ss:$16 sps:$4 sm:$0xff]  }
  0x69   :  { %1729 = vmatpush1.bf16.msra.mxu0 %v4072_v56  ;;  %1893 = vmatpush1.bf16.msra.mxu1 %v4075_v57  ;;  %v4162_v56 = vld [vmem:[%s5952_s2 + $0x500] ss:$16 sps:$4 sm:$0xff]   ;;  %v4165_v57 = vld [vmem:[%s5952_s2 + $0x508] ss:$16 sps:$4 sm:$0xff]  }
  0x6a   :  { %1730 = vmatprep.subr.bf16.mxu0 %v4080_v58  ;;  %1894 = vmatprep.subr.bf16.mxu1 %v4083_v59  ;;  %v4170_v58 = vld [vmem:[%s5952_s2 + $0x524] ss:$16 sps:$4 sm:$0xff]   ;;  %v4173_v59 = vld [vmem:[%s5952_s2 + $0x52c] ss:$16 sps:$4 sm:$0xff]  }
  0x6d   :  { %1731 = vmatpush1.bf16.msra.mxu0 %v4078_v60  ;;  %1895 = vmatpush1.bf16.msra.mxu1 %v4081_v61  ;;  %v4168_v60 = vld [vmem:[%s5952_s2 + $0x520] ss:$16 sps:$4 sm:$0xff]   ;;  %v4171_v61 = vld [vmem:[%s5952_s2 + $0x528] ss:$16 sps:$4 sm:$0xff]  }
  0x6e   :  { %1732 = vmatprep.subr.bf16.mxu0 %v4086_v62  ;;  %1896 = vmatprep.subr.bf16.mxu1 %v4089_v63  ;;  %v4176_v62 = vld [vmem:[%s5952_s2 + $0x544] ss:$16 sps:$4 sm:$0xff]   ;;  %v4179_v63 = vld [vmem:[%s5952_s2 + $0x54c] ss:$16 sps:$4 sm:$0xff]  }
  0x71   :  { %1733 = vmatpush1.bf16.msra.mxu0 %v4084_v0  ;;  %1897 = vmatpush1.bf16.msra.mxu1 %v4087_v1  ;;  %v4174_v0 = vld [vmem:[%s5952_s2 + $0x540] ss:$16 sps:$4 sm:$0xff]   ;;  %v4177_v1 = vld [vmem:[%s5952_s2 + $0x548] ss:$16 sps:$4 sm:$0xff]  }
  0x72   :  { %1734 = vmatprep.subr.bf16.mxu0 %v4092_v2  ;;  %1898 = vmatprep.subr.bf16.mxu1 %v4095_v3  ;;  %v4182_v2 = vld [vmem:[%s5952_s2 + $0x564] ss:$16 sps:$4 sm:$0xff]   ;;  %v4185_v3 = vld [vmem:[%s5952_s2 + $0x56c] ss:$16 sps:$4 sm:$0xff]  }
  0x75   :  { %1735 = vmatpush1.bf16.msra.mxu0 %v4090_v4  ;;  %1899 = vmatpush1.bf16.msra.mxu1 %v4093_v5  ;;  %v4180_v4 = vld [vmem:[%s5952_s2 + $0x560] ss:$16 sps:$4 sm:$0xff]   ;;  %v4183_v5 = vld [vmem:[%s5952_s2 + $0x568] ss:$16 sps:$4 sm:$0xff]  }
  0x76   :  { %1736 = vmatprep.subr.bf16.mxu0 %v4098_v6  ;;  %1900 = vmatprep.subr.bf16.mxu1 %v4101_v7  ;;  %v4188_v6 = vld [vmem:[%s5952_s2 + $0x584] ss:$16 sps:$4 sm:$0xff]   ;;  %v4191_v7 = vld [vmem:[%s5952_s2 + $0x58c] ss:$16 sps:$4 sm:$0xff]  }
  0x79   :  { %1737 = vmatpush1.bf16.msra.mxu0 %v4096_v8  ;;  %1901 = vmatpush1.bf16.msra.mxu1 %v4099_v9  ;;  %v4186_v8 = vld [vmem:[%s5952_s2 + $0x580] ss:$16 sps:$4 sm:$0xff]   ;;  %v4189_v9 = vld [vmem:[%s5952_s2 + $0x588] ss:$16 sps:$4 sm:$0xff]  }
  0x7a   :  { %1738 = vmatprep.subr.bf16.mxu0 %v4104_v10  ;;  %1902 = vmatprep.subr.bf16.mxu1 %v4107_v11  ;;  %v4194_v10 = vld [vmem:[%s5952_s2 + $0x5a4] ss:$16 sps:$4 sm:$0xff]   ;;  %v4197_v11 = vld [vmem:[%s5952_s2 + $0x5ac] ss:$16 sps:$4 sm:$0xff]  }
  0x7d   :  { %1739 = vmatpush1.bf16.msra.mxu0 %v4102_v12  ;;  %1903 = vmatpush1.bf16.msra.mxu1 %v4105_v13  ;;  %v4192_v12 = vld [vmem:[%s5952_s2 + $0x5a0] ss:$16 sps:$4 sm:$0xff]   ;;  %v4195_v13 = vld [vmem:[%s5952_s2 + $0x5a8] ss:$16 sps:$4 sm:$0xff]  }
  0x7e   :  { %1740 = vmatprep.subr.bf16.mxu0 %v4110_v14  ;;  %1904 = vmatprep.subr.bf16.mxu1 %v4113_v16  ;;  %v4200_v14 = vld [vmem:[%s5952_s2 + $0x5c4] ss:$16 sps:$4 sm:$0xff]   ;;  %v4203_v16 = vld [vmem:[%s5952_s2 + $0x5cc] ss:$16 sps:$4 sm:$0xff]  }
  0x81   :  { %1741 = vmatpush1.bf16.msra.mxu0 %v4108_v17  ;;  %1905 = vmatpush1.bf16.msra.mxu1 %v4111_v18  ;;  %v4198_v17 = vld [vmem:[%s5952_s2 + $0x5c0] ss:$16 sps:$4 sm:$0xff]   ;;  %v4201_v18 = vld [vmem:[%s5952_s2 + $0x5c8] ss:$16 sps:$4 sm:$0xff]  }
  0x82   :  { %1751 = vmatprep.subr.bf16.mxu0 %v4116_v19  ;;  %1915 = vmatprep.subr.bf16.mxu1 %v4119_v22  ;;  %v4206_v19 = vld [vmem:[%s5952_s2 + $0x5e4] ss:$16 sps:$4 sm:$0xff]   ;;  %v4209_v22 = vld [vmem:[%s5952_s2 + $0x5ec] ss:$16 sps:$4 sm:$0xff]  }
  0x84   :  { %1743 = vmatmul.mubr.bf16.vlgmr.msra.gmra.mrb[0].mxu0 %v377_v24  ;;  %1907 = vmatmul.mubr.bf16.vlgmr.msra.gmra.mrb[0].mxu1 %v377_v24  ;;  %v4207_v24 = vld [vmem:[%s5952_s2 + $0x5e8] ss:$16 sps:$4 sm:$0xff]  }
  0x85   :  { %1752 = vmatpush1.bf16.msra.mxu0 %v4114_v23  ;;  %1916 = vmatpush1.bf16.msra.mxu1 %v4117_v25  ;;  %v4204_v23 = vld [vmem:[%s5952_s2 + $0x5e0] ss:$16 sps:$4 sm:$0xff]   ;;  %v4213_v25 = vld [vmem:[%s5952_s2 + $0x604] ss:$16 sps:$4 sm:$0xff]  }
  0x86   :  { %1753 = vmatprep.subr.bf16.mxu0 %v4122_v26  ;;  %1917 = vmatprep.subr.bf16.mxu1 %v4125_v27  ;;  %v4216_v26 = vld [vmem:[%s5952_s2 + $0x60c] ss:$16 sps:$4 sm:$0xff]   ;;  %v4211_v27 = vld [vmem:[%s5952_s2 + $0x600] ss:$16 sps:$4 sm:$0xff]  }
  0x87   :  { %1783 = vmatprep.mubr.bf16.mxu0 %v4817_v20  ;;  %1947 = vmatprep.mubr.bf16.mxu1 %v4817_v20 }
  0x89   :  { %1754 = vmatpush1.bf16.msra.mxu0 %v4120_v15  ;;  %1918 = vmatpush1.bf16.msra.mxu1 %v4123_v28  ;;  %v4214_v15 = vld [vmem:[%s5952_s2 + $0x608] ss:$16 sps:$4 sm:$0xff]   ;;  %v4219_v28 = vld [vmem:[%s5952_s2 + $0x624] ss:$16 sps:$4 sm:$0xff]  }
  0x8a   :  { %1755 = vmatprep.subr.bf16.mxu0 %v4128_v29  ;;  %1919 = vmatprep.subr.bf16.mxu1 %v4131_v30  ;;  %v4222_v29 = vld [vmem:[%s5952_s2 + $0x62c] ss:$16 sps:$4 sm:$0xff]   ;;  %v4217_v30 = vld [vmem:[%s5952_s2 + $0x620] ss:$16 sps:$4 sm:$0xff]  }
  0x8d   :  { %1756 = vmatpush1.bf16.msra.mxu0 %v4126_v31  ;;  %1920 = vmatpush1.bf16.msra.mxu1 %v4129_v32  ;;  %v4220_v31 = vld [vmem:[%s5952_s2 + $0x628] ss:$16 sps:$4 sm:$0xff]   ;;  %v380_v32 = vcombine.high %v4817_v20, %v4817_v20  ;;  %v4223_v20 = vld [vmem:[%s5952_s2 + $0x640] ss:$16 sps:$4 sm:$0xff]  }
  0x8e   :  { %1757 = vmatprep.subr.bf16.mxu0 %v4134_v33  ;;  %1921 = vmatprep.subr.bf16.mxu1 %v4137_v34  ;;  %v4225_v33 = vld [vmem:[%s5952_s2 + $0x644] ss:$16 sps:$4 sm:$0xff]   ;;  %v4228_v34 = vld [vmem:[%s5952_s2 + $0x64c] ss:$16 sps:$4 sm:$0xff]  }
  0x91   :  { %1758 = vmatpush1.bf16.msra.mxu0 %v4132_v35  ;;  %1922 = vmatpush1.bf16.msra.mxu1 %v4135_v36  ;;  %v4226_v35 = vld [vmem:[%s5952_s2 + $0x648] ss:$16 sps:$4 sm:$0xff]   ;;  %v4231_v36 = vld [vmem:[%s5952_s2 + $0x664] ss:$16 sps:$4 sm:$0xff]  }
  0x92   :  { %1759 = vmatprep.subr.bf16.mxu0 %v4140_v37  ;;  %1923 = vmatprep.subr.bf16.mxu1 %v4143_v38  ;;  %v4234_v37 = vld [vmem:[%s5952_s2 + $0x66c] ss:$16 sps:$4 sm:$0xff]   ;;  %v4229_v38 = vld [vmem:[%s5952_s2 + $0x660] ss:$16 sps:$4 sm:$0xff]  }
  0x95   :  { %1760 = vmatpush1.bf16.msra.mxu0 %v4138_v39  ;;  %1924 = vmatpush1.bf16.msra.mxu1 %v4141_v40  ;;  %v4232_v39 = vld [vmem:[%s5952_s2 + $0x668] ss:$16 sps:$4 sm:$0xff]   ;;  %v4237_v40 = vld [vmem:[%s5952_s2 + $0x684] ss:$16 sps:$4 sm:$0xff]  }
  0x96   :  { %1761 = vmatprep.subr.bf16.mxu0 %v4146_v41  ;;  %1925 = vmatprep.subr.bf16.mxu1 %v4149_v43  ;;  %v4240_v41 = vld [vmem:[%s5952_s2 + $0x68c] ss:$16 sps:$4 sm:$0xff]   ;;  %v4235_v43 = vld [vmem:[%s5952_s2 + $0x680] ss:$16 sps:$4 sm:$0xff]  }
  0x99   :  { %1762 = vmatpush1.bf16.msra.mxu0 %v4144_v44  ;;  %1926 = vmatpush1.bf16.msra.mxu1 %v4147_v45  ;;  %v4238_v44 = vld [vmem:[%s5952_s2 + $0x688] ss:$16 sps:$4 sm:$0xff]   ;;  %v4243_v45 = vld [vmem:[%s5952_s2 + $0x6a4] ss:$16 sps:$4 sm:$0xff]  }
  0x9a   :  { %1763 = vmatprep.subr.bf16.mxu0 %v4152_v46  ;;  %1927 = vmatprep.subr.bf16.mxu1 %v4155_v47  ;;  %v4246_v46 = vld [vmem:[%s5952_s2 + $0x6ac] ss:$16 sps:$4 sm:$0xff]   ;;  %v4241_v47 = vld [vmem:[%s5952_s2 + $0x6a0] ss:$16 sps:$4 sm:$0xff]  }
  0x9d   :  { %1764 = vmatpush1.bf16.msra.mxu0 %v4150_v48  ;;  %1928 = vmatpush1.bf16.msra.mxu1 %v4153_v49  ;;  %v4244_v48 = vld [vmem:[%s5952_s2 + $0x6a8] ss:$16 sps:$4 sm:$0xff]  }
  0x9e   :  { %1765 = vmatprep.subr.bf16.mxu0 %v4158_v50  ;;  %1929 = vmatprep.subr.bf16.mxu1 %v4161_v51 }
  0xa1   :  { %1766 = vmatpush1.bf16.msra.mxu0 %v4156_v52  ;;  %1930 = vmatpush1.bf16.msra.mxu1 %v4159_v53 }
  0xa2   :  { %1767 = vmatprep.subr.bf16.mxu0 %v4164_v54  ;;  %1931 = vmatprep.subr.bf16.mxu1 %v4167_v55 }
  0xa5   :  { %1768 = vmatpush1.bf16.msra.mxu0 %v4162_v56  ;;  %1932 = vmatpush1.bf16.msra.mxu1 %v4165_v57 }
  0xa6   :  { %1769 = vmatprep.subr.bf16.mxu0 %v4170_v58  ;;  %1933 = vmatprep.subr.bf16.mxu1 %v4173_v59 }
  0xa9   :  { %1770 = vmatpush1.bf16.msra.mxu0 %v4168_v60  ;;  %1934 = vmatpush1.bf16.msra.mxu1 %v4171_v61 }
  0xaa   :  { %1771 = vmatprep.subr.bf16.mxu0 %v4176_v62  ;;  %1935 = vmatprep.subr.bf16.mxu1 %v4179_v63 }
  0xad   :  { %1772 = vmatpush1.bf16.msra.mxu0 %v4174_v0  ;;  %1936 = vmatpush1.bf16.msra.mxu1 %v4177_v1 }
  0xae   :  { %1773 = vmatprep.subr.bf16.mxu0 %v4182_v2  ;;  %1937 = vmatprep.subr.bf16.mxu1 %v4185_v3 }
  0xb1   :  { %1774 = vmatpush1.bf16.msra.mxu0 %v4180_v4  ;;  %1938 = vmatpush1.bf16.msra.mxu1 %v4183_v5 }
  0xb2   :  { %1775 = vmatprep.subr.bf16.mxu0 %v4188_v6  ;;  %1939 = vmatprep.subr.bf16.mxu1 %v4191_v7 }
  0xb5   :  { %1776 = vmatpush1.bf16.msra.mxu0 %v4186_v8  ;;  %1940 = vmatpush1.bf16.msra.mxu1 %v4189_v9 }
  0xb6   :  { %1777 = vmatprep.subr.bf16.mxu0 %v4194_v10  ;;  %1941 = vmatprep.subr.bf16.mxu1 %v4197_v11 }
  0xb9   :  { %1778 = vmatpush1.bf16.msra.mxu0 %v4192_v12  ;;  %1942 = vmatpush1.bf16.msra.mxu1 %v4195_v13 }
  0xba   :  { %1779 = vmatprep.subr.bf16.mxu0 %v4200_v14  ;;  %1943 = vmatprep.subr.bf16.mxu1 %v4203_v16 }
  0xbd   :  { %1780 = vmatpush1.bf16.msra.mxu0 %v4198_v17  ;;  %1944 = vmatpush1.bf16.msra.mxu1 %v4201_v18 }
  0xbe   :  { %1781 = vmatprep.subr.bf16.mxu0 %v4206_v19  ;;  %1945 = vmatprep.subr.bf16.mxu1 %v4209_v22 }
  0xc1   :  { %1782 = vmatpush1.bf16.msra.mxu0 %v4204_v23  ;;  %1946 = vmatpush1.bf16.msra.mxu1 %v4207_v24 }
  0xc2   :  { %1792 = vmatprep.subr.bf16.mxu0 %v4213_v25  ;;  %1956 = vmatprep.subr.bf16.mxu1 %v4216_v26 }
  0xc4   :  { %1784 = vmatmul.mubr.bf16.vlgmr.msra.gmra.mrb[0].mxu0 %v4820_v21  ;;  %1948 = vmatmul.mubr.bf16.vlgmr.msra.gmra.mrb[0].mxu1 %v4820_v21 }
  0xc5   :  { %1793 = vmatpush1.bf16.msra.mxu0 %v4211_v27  ;;  %1957 = vmatpush1.bf16.msra.mxu1 %v4214_v15 }
  0xc6   :  { %1794 = vmatprep.subr.bf16.mxu0 %v4219_v28  ;;  %1958 = vmatprep.subr.bf16.mxu1 %v4222_v29 }
  0xc7   :  { %1824 = vmatprep.mubr.bf16.mxu0 %v380_v32  ;;  %1988 = vmatprep.mubr.bf16.mxu1 %v380_v32 }
  0xc9   :  { %1795 = vmatpush1.bf16.msra.mxu0 %v4217_v30  ;;  %1959 = vmatpush1.bf16.msra.mxu1 %v4220_v31 }
  0xca   :  { %1796 = vmatprep.subr.bf16.mxu0 %v4225_v33  ;;  %1960 = vmatprep.subr.bf16.mxu1 %v4228_v34 }
  0xcd   :  { %1797 = vmatpush1.bf16.msra.mxu0 %v4223_v20  ;;  %1961 = vmatpush1.bf16.msra.mxu1 %v4226_v35 }
  0xce   :  { %1798 = vmatprep.subr.bf16.mxu0 %v4231_v36  ;;  %1962 = vmatprep.subr.bf16.mxu1 %v4234_v37 }
  0xd1   :  { %1799 = vmatpush1.bf16.msra.mxu0 %v4229_v38  ;;  %1963 = vmatpush1.bf16.msra.mxu1 %v4232_v39 }
  0xd2   :  { %1800 = vmatprep.subr.bf16.mxu0 %v4237_v40  ;;  %1964 = vmatprep.subr.bf16.mxu1 %v4240_v41 }
  0xd5   :  { %1801 = vmatpush1.bf16.msra.mxu0 %v4235_v43  ;;  %1965 = vmatpush1.bf16.msra.mxu1 %v4238_v44 }
  0xd6   :  { %24 = vsyncpa [#allocation5], 0  ;;  %1802 = vmatprep.subr.bf16.mxu0 %v4243_v45  ;;  %1966 = vmatprep.subr.bf16.mxu1 %v4246_v46  ;;  %v4249_v49 = vld [vmem:[%s5952_s2 + $0x6c4] ss:$16 sps:$4 sm:$0xff]   ;;  %v4252_v50 = vld [vmem:[%s5952_s2 + $0x6cc] ss:$16 sps:$4 sm:$0xff]   ;;  %v378_v28 = vcombine.high %v4820_v21, %v4820_v21 }
  0xd7   :  { %v4247_v51 = vld [vmem:[%s5952_s2 + $0x6c0] ss:$16 sps:$4 sm:$0xff]   ;;  %v4250_v52 = vld [vmem:[%s5952_s2 + $0x6c8] ss:$16 sps:$4 sm:$0xff]   ;;  %v4255_v53 = vld [vmem:[%s5952_s2 + $0x6e4] ss:$16 sps:$4 sm:$0xff]  }
  0xd8   :  { %v4258_v54 = vld [vmem:[%s5952_s2 + $0x6ec] ss:$16 sps:$4 sm:$0xff]   ;;  %v4253_v55 = vld [vmem:[%s5952_s2 + $0x6e0] ss:$16 sps:$4 sm:$0xff]   ;;  %v4256_v56 = vld [vmem:[%s5952_s2 + $0x6e8] ss:$16 sps:$4 sm:$0xff]  }
  0xd9   :  { %1803 = vmatpush1.bf16.msra.mxu0 %v4241_v47  ;;  %1967 = vmatpush1.bf16.msra.mxu1 %v4244_v48  ;;  %v4261_v57 = vld [vmem:[%s5952_s2 + $0x704] ss:$16 sps:$4 sm:$0xff]   ;;  %v4264_v58 = vld [vmem:[%s5952_s2 + $0x70c] ss:$16 sps:$4 sm:$0xff]   ;;  %v4259_v59 = vld [vmem:[%s5952_s2 + $0x700] ss:$16 sps:$4 sm:$0xff]  }
  0xda   :  { %1804 = vmatprep.subr.bf16.mxu0 %v4249_v49  ;;  %1968 = vmatprep.subr.bf16.mxu1 %v4252_v50  ;;  %v4262_v60 = vld [vmem:[%s5952_s2 + $0x708] ss:$16 sps:$4 sm:$0xff]   ;;  %v4267_v61 = vld [vmem:[%s5952_s2 + $0x724] ss:$16 sps:$4 sm:$0xff]   ;;  %v4270_v62 = vld [vmem:[%s5952_s2 + $0x72c] ss:$16 sps:$4 sm:$0xff]  }
  0xdb   :  { %v4265_v63 = vld [vmem:[%s5952_s2 + $0x720] ss:$16 sps:$4 sm:$0xff]   ;;  %v4268_v0 = vld [vmem:[%s5952_s2 + $0x728] ss:$16 sps:$4 sm:$0xff]   ;;  %v4273_v1 = vld [vmem:[%s5952_s2 + $0x744] ss:$16 sps:$4 sm:$0xff]  }
  0xdc   :  { %v4276_v2 = vld [vmem:[%s5952_s2 + $0x74c] ss:$16 sps:$4 sm:$0xff]   ;;  %v4271_v3 = vld [vmem:[%s5952_s2 + $0x740] ss:$16 sps:$4 sm:$0xff]   ;;  %v4274_v4 = vld [vmem:[%s5952_s2 + $0x748] ss:$16 sps:$4 sm:$0xff]  }
  0xdd   :  { %1805 = vmatpush1.bf16.msra.mxu0 %v4247_v51  ;;  %1969 = vmatpush1.bf16.msra.mxu1 %v4250_v52  ;;  %v4279_v5 = vld [vmem:[%s5952_s2 + $0x764] ss:$16 sps:$4 sm:$0xff]   ;;  %v4282_v6 = vld [vmem:[%s5952_s2 + $0x76c] ss:$16 sps:$4 sm:$0xff]   ;;  %v4277_v7 = vld [vmem:[%s5952_s2 + $0x760] ss:$16 sps:$4 sm:$0xff]  }
  0xde   :  { %1806 = vmatprep.subr.bf16.mxu0 %v4255_v53  ;;  %1970 = vmatprep.subr.bf16.mxu1 %v4258_v54  ;;  %v4280_v8 = vld [vmem:[%s5952_s2 + $0x768] ss:$16 sps:$4 sm:$0xff]   ;;  %v4285_v9 = vld [vmem:[%s5952_s2 + $0x784] ss:$16 sps:$4 sm:$0xff]   ;;  %v4288_v10 = vld [vmem:[%s5952_s2 + $0x78c] ss:$16 sps:$4 sm:$0xff]  }
  0xdf   :  { %v4283_v11 = vld [vmem:[%s5952_s2 + $0x780] ss:$16 sps:$4 sm:$0xff]   ;;  %v4286_v12 = vld [vmem:[%s5952_s2 + $0x788] ss:$16 sps:$4 sm:$0xff]   ;;  %v4291_v13 = vld [vmem:[%s5952_s2 + $0x7a4] ss:$16 sps:$4 sm:$0xff]  }
  0xe0   :  { %v4294_v14 = vld [vmem:[%s5952_s2 + $0x7ac] ss:$16 sps:$4 sm:$0xff]   ;;  %v4289_v16 = vld [vmem:[%s5952_s2 + $0x7a0] ss:$16 sps:$4 sm:$0xff]   ;;  %v4292_v17 = vld [vmem:[%s5952_s2 + $0x7a8] ss:$16 sps:$4 sm:$0xff]  }
  0xe1   :  { %1807 = vmatpush1.bf16.msra.mxu0 %v4253_v55  ;;  %1971 = vmatpush1.bf16.msra.mxu1 %v4256_v56  ;;  %v4297_v18 = vld [vmem:[%s5952_s2 + $0x7c4] ss:$16 sps:$4 sm:$0xff]   ;;  %v4300_v19 = vld [vmem:[%s5952_s2 + $0x7cc] ss:$16 sps:$4 sm:$0xff]   ;;  %v4295_v22 = vld [vmem:[%s5952_s2 + $0x7c0] ss:$16 sps:$4 sm:$0xff]  }
  0xe2   :  { %1808 = vmatprep.subr.bf16.mxu0 %v4261_v57  ;;  %1972 = vmatprep.subr.bf16.mxu1 %v4264_v58  ;;  %v4298_v23 = vld [vmem:[%s5952_s2 + $0x7c8] ss:$16 sps:$4 sm:$0xff]   ;;  %v4303_v24 = vld [vmem:[%s5952_s2 + $0x7e4] ss:$16 sps:$4 sm:$0xff]   ;;  %v4306_v25 = vld [vmem:[%s5952_s2 + $0x7ec] ss:$16 sps:$4 sm:$0xff]  }
  0xe3   :  { %v4301_v26 = vld [vmem:[%s5952_s2 + $0x7e0] ss:$16 sps:$4 sm:$0xff]   ;;  %v4304_v27 = vld [vmem:[%s5952_s2 + $0x7e8] ss:$16 sps:$4 sm:$0xff]   ;;  %v4309_v15 = vld [vmem:[%s5954_s4 + $0x4] ss:$8 sps:$4 sm:$0xff]  }
  0xe4   :  { %v4307_v29 = vld [vmem:[%s5954_s4] ss:$8 sps:$4 sm:$0xff]   ;;  %v4312_v30 = vld [vmem:[%s5954_s4 + $0x14] ss:$8 sps:$4 sm:$0xff]   ;;  %v4310_v31 = vld [vmem:[%s5954_s4 + $0x10] ss:$8 sps:$4 sm:$0xff]  }
  0xe5   :  { %1809 = vmatpush1.bf16.msra.mxu0 %v4259_v59  ;;  %1973 = vmatpush1.bf16.msra.mxu1 %v4262_v60  ;;  %v4315_v21 = vld [vmem:[%s5954_s4 + $0x24] ss:$8 sps:$4 sm:$0xff]   ;;  %v4313_v32 = vld [vmem:[%s5954_s4 + $0x20] ss:$8 sps:$4 sm:$0xff]   ;;  %v4318_v33 = vld [vmem:[%s5954_s4 + $0x34] ss:$8 sps:$4 sm:$0xff]  }
  0xe6   :  { %1810 = vmatprep.subr.bf16.mxu0 %v4267_v61  ;;  %1974 = vmatprep.subr.bf16.mxu1 %v4270_v62  ;;  %v4316_v34 = vld [vmem:[%s5954_s4 + $0x30] ss:$8 sps:$4 sm:$0xff]   ;;  %v4321_v20 = vld [vmem:[%s5954_s4 + $0x44] ss:$8 sps:$4 sm:$0xff]   ;;  %v4319_v35 = vld [vmem:[%s5954_s4 + $0x40] ss:$8 sps:$4 sm:$0xff]  }
  0xe7   :  { %v4324_v36 = vld [vmem:[%s5954_s4 + $0x54] ss:$8 sps:$4 sm:$0xff]   ;;  %v4322_v37 = vld [vmem:[%s5954_s4 + $0x50] ss:$8 sps:$4 sm:$0xff]   ;;  %v4327_v38 = vld [vmem:[%s5954_s4 + $0x64] ss:$8 sps:$4 sm:$0xff]  }
  0xe8   :  { %v4325_v39 = vld [vmem:[%s5954_s4 + $0x60] ss:$8 sps:$4 sm:$0xff]   ;;  %v4330_v40 = vld [vmem:[%s5954_s4 + $0x74] ss:$8 sps:$4 sm:$0xff]   ;;  %v4328_v41 = vld [vmem:[%s5954_s4 + $0x70] ss:$8 sps:$4 sm:$0xff]  }
  0xe9   :  { %1811 = vmatpush1.bf16.msra.mxu0 %v4265_v63  ;;  %1975 = vmatpush1.bf16.msra.mxu1 %v4268_v0  ;;  %v4333_v43 = vld [vmem:[%s5954_s4 + $0x84] ss:$8 sps:$4 sm:$0xff]   ;;  %v4331_v44 = vld [vmem:[%s5954_s4 + $0x80] ss:$8 sps:$4 sm:$0xff]   ;;  %v4336_v45 = vld [vmem:[%s5954_s4 + $0x94] ss:$8 sps:$4 sm:$0xff]  }
  0xea   :  { %1812 = vmatprep.subr.bf16.mxu0 %v4273_v1  ;;  %1976 = vmatprep.subr.bf16.mxu1 %v4276_v2  ;;  %v4334_v46 = vld [vmem:[%s5954_s4 + $0x90] ss:$8 sps:$4 sm:$0xff]   ;;  %v4339_v47 = vld [vmem:[%s5954_s4 + $0xa4] ss:$8 sps:$4 sm:$0xff]   ;;  %v4337_v48 = vld [vmem:[%s5954_s4 + $0xa0] ss:$8 sps:$4 sm:$0xff]  }
  0xeb   :  { %v4342_v49 = vld [vmem:[%s5954_s4 + $0xb4] ss:$8 sps:$4 sm:$0xff]   ;;  %v4340_v50 = vld [vmem:[%s5954_s4 + $0xb0] ss:$8 sps:$4 sm:$0xff]   ;;  %v4345_v51 = vld [vmem:[%s5954_s4 + $0xc4] ss:$8 sps:$4 sm:$0xff]  }
  0xec   :  { %v4343_v52 = vld [vmem:[%s5954_s4 + $0xc0] ss:$8 sps:$4 sm:$0xff]   ;;  %v4348_v53 = vld [vmem:[%s5954_s4 + $0xd4] ss:$8 sps:$4 sm:$0xff]   ;;  %v4346_v54 = vld [vmem:[%s5954_s4 + $0xd0] ss:$8 sps:$4 sm:$0xff]  }
  0xed   :  { %1813 = vmatpush1.bf16.msra.mxu0 %v4271_v3  ;;  %1977 = vmatpush1.bf16.msra.mxu1 %v4274_v4  ;;  %v4351_v55 = vld [vmem:[%s5954_s4 + $0xe4] ss:$8 sps:$4 sm:$0xff]   ;;  %v4349_v56 = vld [vmem:[%s5954_s4 + $0xe0] ss:$8 sps:$4 sm:$0xff]   ;;  %v4354_v57 = vld [vmem:[%s5954_s4 + $0xf4] ss:$8 sps:$4 sm:$0xff]  }
  0xee   :  { %1814 = vmatprep.subr.bf16.mxu0 %v4279_v5  ;;  %1978 = vmatprep.subr.bf16.mxu1 %v4282_v6  ;;  %v4352_v58 = vld [vmem:[%s5954_s4 + $0xf0] ss:$8 sps:$4 sm:$0xff]   ;;  %v4357_v59 = vld [vmem:[%s5954_s4 + $0x104] ss:$8 sps:$4 sm:$0xff]   ;;  %vm2691_vm0 = vcmask 1043456   ;;  %vm3381_vm1 = vcmask 58368  }
  0xef   :  { %v4403_v60 = vld [vmem:[%s5956_s6 + $0x40] sm:$0xff]   ;;  %v4405_v62 = vld [vmem:[%s5956_s6 + $0x48] sm:$0xff]   ;;  %v4407_v0 = vld [vmem:[%s5956_s6 + $0x50] sm:$0xff]   ;;  %s4494_s29 = smov 120   ;;  %vm4496_vm2 = vmmov 0   ;;  %vm3386_vm3 = vcmask 1024  }
  0xf0   :  { %v4404_v61 = vld [vmem:[%s5956_s6] sm:$0xff]   ;;  %v4406_v63 = vld [vmem:[%s5956_s6 + $0x8] sm:$0xff]   ;;  %v4408_v1 = vld [vmem:[%s5956_s6 + $0x10] sm:$0xff]   ;;  %s5971_s23 = sld [smem:[#allocation10_spill]]  ;;  %vm2687_vm4 = vcmask 64512   ;;  %s4499_s27 = smov [#allocation2]  }
  0xf1   :  { %1815 = vmatpush1.bf16.msra.mxu0 %v4277_v7  ;;  %1979 = vmatpush1.bf16.msra.mxu1 %v4280_v8  ;;  %v4409_v2 = vld [vmem:[%s5956_s6 + $0x58] sm:$0xff]   ;;  %v4411_v4 = vld [vmem:[%s5956_s6 + $0x60] sm:$0xff]   ;;  %v4413_v6 = vld [vmem:[%s5956_s6 + $0x68] sm:$0xff]   ;;  %v5528_v8 = vsub.s32 0, %v4709_v42  ;;  %s3401_s28 = sshll.u32 %s4499_s27, 4  ;;  %s3402_s28 = int_to_ptr.vmem [resolvable:$true] %s3401_s28 }
  0xf2   :  { %1816 = vmatprep.subr.bf16.mxu0 %v4285_v9  ;;  %1980 = vmatprep.subr.bf16.mxu1 %v4288_v10  ;;  %v4410_v3 = vld [vmem:[%s5956_s6 + $0x18] sm:$0xff]   ;;  %v4412_v5 = vld [vmem:[%s5956_s6 + $0x20] sm:$0xff]   ;;  %v4414_v7 = vld [vmem:[%s5956_s6 + $0x28] sm:$0xff]   ;;  %v5536_v10 = vsub.s32 1, %v4709_v42 }
  0xf3   :  { %v5533_v9 = vld [vmem:[%s5953_s3] sm:$0xf] }
  0xf5   :  { %1817 = vmatpush1.bf16.msra.mxu0 %v4283_v11  ;;  %1981 = vmatpush1.bf16.msra.mxu1 %v4286_v12  ;;  %v325_v11 = vsub.s32 3, %v4709_v42  ;;  %v314_v12 = vrot.slane %v5533_v9, %v5528_v8 }
  0xf6   :  { %1818 = vmatprep.subr.bf16.mxu0 %v4291_v13  ;;  %1982 = vmatprep.subr.bf16.mxu1 %v4294_v14  ;;  %v318_v13 = vrot.slane %v5533_v9, %v5536_v10 }
  0xf7   :  { %v326_v14 = vrot.slane %v5533_v9, %v325_v11 }
  0xf9   :  { %1819 = vmatpush1.bf16.msra.mxu0 %v4289_v16  ;;  %1983 = vmatpush1.bf16.msra.mxu1 %v4292_v17 }
  0xfa   :  { %1820 = vmatprep.subr.bf16.mxu0 %v4297_v18  ;;  %1984 = vmatprep.subr.bf16.mxu1 %v4300_v19 }
  0xfd   :  { %1821 = vmatpush1.bf16.msra.mxu0 %v4295_v22  ;;  %1985 = vmatpush1.bf16.msra.mxu1 %v4298_v23 }
  0xfe   :  { %1822 = vmatprep.subr.bf16.mxu0 %v4303_v24  ;;  %1986 = vmatprep.subr.bf16.mxu1 %v4306_v25 }
 0x101   :  { %1823 = vmatpush1.bf16.msra.mxu0 %v4301_v26  ;;  %1987 = vmatpush1.bf16.msra.mxu1 %v4304_v27 }
 0x102   :  { %2401 = vmatprep.subr.bf16.mxu0 %v4309_v15  ;;  %3846 = vmatprep.subr.bf16.mxu1 %v4403_v60  ;;  %v4394_v60 = vld [vmem:[%s5954_s4 + $0x1d0] ss:$8 sps:$4 sm:$0xff]  }
 0x104   :  { %1825 = vmatmul.mubr.bf16.vlgmr.msra.gmra.mrb[0].mxu0 %v378_v28  ;;  %1989 = vmatmul.mubr.bf16.vlgmr.msra.gmra.mrb[0].mxu1 %v378_v28 }
 0x105   :  { %2402 = vmatpush1.bf16.msra.mxu0 %v4307_v29  ;;  %3847 = vmatpush3.bf16.msra.mxu1 %v4404_v61 }
 0x106   :  { %2403 = vmatprep.subr.bf16.mxu0 %v4312_v30  ;;  %3848 = vmatprep.subr.bf16.mxu1 %v4405_v62  ;;  %v4399_v62 = vld [vmem:[%s5954_s4 + $0x1e4] ss:$8 sps:$4 sm:$0xff]  }
 0x109   :  { %2404 = vmatpush1.bf16.msra.mxu0 %v4310_v31  ;;  %3849 = vmatpush3.bf16.msra.mxu1 %v4406_v63  ;;  %v4397_v63 = vld [vmem:[%s5954_s4 + $0x1e0] ss:$8 sps:$4 sm:$0xff]  }
 0x10a   :  { %2405 = vmatprep.subr.bf16.mxu0 %v4315_v21  ;;  %3850 = vmatprep.subr.bf16.mxu1 %v4407_v0  ;;  %v4355_v21 = vld [vmem:[%s5954_s4 + $0x100] ss:$8 sps:$4 sm:$0xff]  }
 0x10d   :  { %2406 = vmatpush1.bf16.msra.mxu0 %v4313_v32  ;;  %3851 = vmatpush3.bf16.msra.mxu1 %v4408_v1  ;;  %v4402_v1 = vld [vmem:[%s5954_s4 + $0x1f4] ss:$8 sps:$4 sm:$0xff]  }
 0x10e   :  { %2407 = vmatprep.subr.bf16.mxu0 %v4318_v33  ;;  %3852 = vmatprep.subr.bf16.mxu1 %v4409_v2  ;;  %v4360_v33 = vld [vmem:[%s5954_s4 + $0x114] ss:$8 sps:$4 sm:$0xff]   ;;  %v4400_v2 = vld [vmem:[%s5954_s4 + $0x1f0] ss:$8 sps:$4 sm:$0xff]  }
 0x111   :  { %2408 = vmatpush1.bf16.msra.mxu0 %v4316_v34  ;;  %3853 = vmatpush3.bf16.msra.mxu1 %v4410_v3 }
 0x112   :  { %2409 = vmatprep.subr.bf16.mxu0 %v4321_v20  ;;  %3854 = vmatprep.subr.bf16.mxu1 %v4411_v4  ;;  %v4358_v20 = vld [vmem:[%s5954_s4 + $0x110] ss:$8 sps:$4 sm:$0xff]  }
 0x115   :  { %2410 = vmatpush1.bf16.msra.mxu0 %v4319_v35  ;;  %3855 = vmatpush3.bf16.msra.mxu1 %v4412_v5  ;;  %v4363_v35 = vld [vmem:[%s5954_s4 + $0x124] ss:$8 sps:$4 sm:$0xff]   ;;  %v4415_v5 = vld [vmem:[%s5956_s6 + $0x70] sm:$0xff]  }
 0x116   :  { %2411 = vmatprep.subr.bf16.mxu0 %v4324_v36  ;;  %3856 = vmatprep.subr.bf16.mxu1 %v4413_v6  ;;  %v4361_v36 = vld [vmem:[%s5954_s4 + $0x120] ss:$8 sps:$4 sm:$0xff]   ;;  %v4416_v6 = vld [vmem:[%s5956_s6 + $0x30] sm:$0xff]  }
 0x119   :  { %2412 = vmatpush1.bf16.msra.mxu0 %v4322_v37  ;;  %3857 = vmatpush3.bf16.msra.mxu1 %v4414_v7  ;;  %v4366_v37 = vld [vmem:[%s5954_s4 + $0x134] ss:$8 sps:$4 sm:$0xff]  }
 0x11a   :  { %2413 = vmatprep.subr.bf16.mxu0 %v4327_v38  ;;  %v4364_v38 = vld [vmem:[%s5954_s4 + $0x130] ss:$8 sps:$4 sm:$0xff]   ;;  %3858 = vmatprep.subr.bf16.mxu1 %v4415_v5 }
 0x11b   :  { %v4417_v7 = vld [vmem:[%s5956_s6 + $0x78] sm:$0xff]  }
 0x11d   :  { %2414 = vmatpush1.bf16.msra.mxu0 %v4325_v39  ;;  %v4369_v39 = vld [vmem:[%s5954_s4 + $0x144] ss:$8 sps:$4 sm:$0xff]   ;;  %3859 = vmatpush3.bf16.msra.mxu1 %v4416_v6 }
 0x11e   :  { %2415 = vmatprep.subr.bf16.mxu0 %v4330_v40  ;;  %v4367_v40 = vld [vmem:[%s5954_s4 + $0x140] ss:$8 sps:$4 sm:$0xff]   ;;  %3860 = vmatprep.subr.bf16.mxu1 %v4417_v7 }
 0x11f   :  { %v2662_v7 = vld [vmem:[%s5971_s23] sm:$0x3] }
 0x121   :  { %2416 = vmatpush1.bf16.msra.mxu0 %v4328_v41  ;;  %v4372_v41 = vld [vmem:[%s5954_s4 + $0x154] ss:$8 sps:$4 sm:$0xff]  }
 0x122   :  { %2417 = vmatprep.subr.bf16.mxu0 %v4333_v43  ;;  %v4370_v43 = vld [vmem:[%s5954_s4 + $0x150] ss:$8 sps:$4 sm:$0xff]  }
 0x125   :  { %2418 = vmatpush1.bf16.msra.mxu0 %v4331_v44  ;;  %v4375_v44 = vld [vmem:[%s5954_s4 + $0x164] ss:$8 sps:$4 sm:$0xff]  }
 0x126   :  { %2419 = vmatprep.subr.bf16.mxu0 %v4336_v45  ;;  %v4373_v45 = vld [vmem:[%s5954_s4 + $0x160] ss:$8 sps:$4 sm:$0xff]  }
 0x129   :  { %2420 = vmatpush1.bf16.msra.mxu0 %v4334_v46  ;;  %v4378_v46 = vld [vmem:[%s5954_s4 + $0x174] ss:$8 sps:$4 sm:$0xff]  }
 0x12a   :  { %2421 = vmatprep.subr.bf16.mxu0 %v4339_v47  ;;  %v4376_v47 = vld [vmem:[%s5954_s4 + $0x170] ss:$8 sps:$4 sm:$0xff]  }
 0x12d   :  { %2422 = vmatpush1.bf16.msra.mxu0 %v4337_v48  ;;  %v4381_v48 = vld [vmem:[%s5954_s4 + $0x184] ss:$8 sps:$4 sm:$0xff]  }
 0x12e   :  { %2423 = vmatprep.subr.bf16.mxu0 %v4342_v49  ;;  %v4379_v49 = vld [vmem:[%s5954_s4 + $0x180] ss:$8 sps:$4 sm:$0xff]  }
 0x131   :  { %2424 = vmatpush1.bf16.msra.mxu0 %v4340_v50  ;;  %v4384_v50 = vld [vmem:[%s5954_s4 + $0x194] ss:$8 sps:$4 sm:$0xff]  }
 0x132   :  { %2425 = vmatprep.subr.bf16.mxu0 %v4345_v51  ;;  %v4382_v51 = vld [vmem:[%s5954_s4 + $0x190] ss:$8 sps:$4 sm:$0xff]  }
 0x135   :  { %2426 = vmatpush1.bf16.msra.mxu0 %v4343_v52  ;;  %v4387_v52 = vld [vmem:[%s5954_s4 + $0x1a4] ss:$8 sps:$4 sm:$0xff]  }
 0x136   :  { %2427 = vmatprep.subr.bf16.mxu0 %v4348_v53  ;;  %v4385_v53 = vld [vmem:[%s5954_s4 + $0x1a0] ss:$8 sps:$4 sm:$0xff]  }
 0x139   :  { %2428 = vmatpush1.bf16.msra.mxu0 %v4346_v54  ;;  %v4390_v54 = vld [vmem:[%s5954_s4 + $0x1b4] ss:$8 sps:$4 sm:$0xff]  }
 0x13a   :  { %2429 = vmatprep.subr.bf16.mxu0 %v4351_v55  ;;  %v4388_v55 = vld [vmem:[%s5954_s4 + $0x1b0] ss:$8 sps:$4 sm:$0xff]  }
 0x13d   :  { %2430 = vmatpush1.bf16.msra.mxu0 %v4349_v56  ;;  %v4393_v56 = vld [vmem:[%s5954_s4 + $0x1c4] ss:$8 sps:$4 sm:$0xff]  }
 0x13e   :  { %2431 = vmatprep.subr.bf16.mxu0 %v4354_v57  ;;  %v4391_v57 = vld [vmem:[%s5954_s4 + $0x1c0] ss:$8 sps:$4 sm:$0xff]  }
 0x141   :  { %2432 = vmatpush1.bf16.msra.mxu0 %v4352_v58  ;;  %v321_v58 = vsub.s32 2, %v4709_v42 }
 0x142   :  { %2442 = vmatprep.subr.bf16.mxu0 %v4357_v59  ;;  %v4396_v59 = vld [vmem:[%s5954_s4 + $0x1d4] ss:$8 sps:$4 sm:$0xff]  }
 0x143   :  { %v322_v61 = vrot.slane %v5533_v9, %v321_v58  ;;  %v4418_v9 = vld [vmem:[%s5956_s6 + $0x38] sm:$0xff]   ;;  %s4498_s6 = smov [#allocation4]  }
 0x144   :  { %3861 = vmatpush3.bf16.msra.mxu1 %v4418_v9 }
 0x1d7   :  { %v1826_v16 = vpop.f32.mrb[0].mxu0  ;;  %v5546_v17 = vpop.f32.mrb[0].mxu1 }
 0x1d8   :  { %v3876_v18 = vadd.f32 %v1826_v16, %v314_v12  ;;  %v1828_v19 = vpop.f32.mrb[1].mxu0  ;;  %v1992_v22 = vpop.f32.mrb[1].mxu1  ;;  %v3878_v0 = vadd.f32 %v5546_v17, %v322_v61  ;;  %v2069_v12 = vld [vmem:[%s5955_s5] sm:$0x3]  ;;  %v2784_v61 = vld [vmem:[%s5961_s11 + $0x138] sm:$0xff]  ;;  %s3413_s5 = sshll.u32 %s4498_s6, 4  ;;  %s3414_s5 = int_to_ptr.vmem [resolvable:$true] %s3413_s5 }
 0x1d9   :  { %v3877_v23 = vadd.f32 %v1828_v19, %v318_v13  ;;  %v3879_v24 = vadd.f32 %v1992_v22, %v326_v14  ;;  %v1830_v25 = vpop.f32.mrb[2].mxu0  ;;  %v1994_v26 = vpop.f32.mrb[2].mxu1  ;;  %v2074_v13 = vrot.slane %v2069_v12, %v5528_v8  ;;  %v2078_v14 = vrot.slane %v2069_v12, %v5536_v10  ;;  %p4426_p1 = scmp.lt.s32.totalorder %s3414_s5, %s3414_s5 }
 0x1da   :  { %v1997_v27 = vmax.f32 %v3876_v18, 0.0  ;;  %v1831_v15 = vpop.f32.mrb[3].mxu0  ;;  %v1995_v28 = vpop.f32.mrb[3].mxu1  ;;  %v1999_v3 = vmax.f32 %v3878_v0, 0.0  ;;  %v2788_v0 = vld [vmem:[%s5961_s11 + $0x158] sm:$0xff] }
 0x1db   :  { %v1998_v29 = vmax.f32 %v3877_v23, 0.0  ;;  %v2000_v30 = vmax.f32 %v3879_v24, 0.0  ;;  %v4492_v15 = vmov 16   ;;  %v2673_v28 = vld [vmem:[%s5958_s8] sm:$0xf]  ;;  %s4495_s8 = smov 112  }
 0x1dc   :  { %v2001_v32 = vpack.c.bf16 %v1997_v27, %v1997_v27  ;;  %v2003_v4 = vpack.c.bf16 %v1999_v3, %v1999_v3  ;;  %3921 = vset.pattern.permute.xlu0 %v4492_v15 }
 0x1dd   :  { %v2002_v31 = vpack.c.bf16 %v1998_v29, %v1998_v29  ;;  %v2004_v34 = vpack.c.bf16 %v2000_v30, %v2000_v30  ;;  %v4493_v29 = vmov 0.0   ;;  %v2693_v30 = vsel %vm2691_vm0, %v2673_v28, 0  ;;  %v2777_v28 = vld [vmem:[%s5961_s11 + $0x100] sm:$0xff] }
 0x1de   :  { %3870 = vmatprep.subr.bf16.mxu1 %v4493_v29 }
 0x1df   :  { %2433 = vmatprep.mubr.bf16.mxu0 %v2002_v31 }
 0x1e0   :  { %2434 = vmatmul.mubr.bf16.vlgmr.msra.gmra.mrb[4].mxu0 %v2001_v32 }
 0x1e1   :  { %2443 = vmatpush1.bf16.msra.mxu0 %v4355_v21  ;;  %2474 = vmatprep.mubr.bf16.mxu0 %v2004_v34  ;;  %v3762_v21 = vld [vmem:[%s5957_s7] ss:$0 sm:$0xff] }
 0x1e2   :  { %2444 = vmatprep.subr.bf16.mxu0 %v4360_v33 }
 0x1e5   :  { %2445 = vmatpush1.bf16.msra.mxu0 %v4358_v20 }
 0x1e6   :  { %2446 = vmatprep.subr.bf16.mxu0 %v4363_v35 }
 0x1e9   :  { %2447 = vmatpush1.bf16.msra.mxu0 %v4361_v36 }
 0x1ea   :  { %2448 = vmatprep.subr.bf16.mxu0 %v4366_v37 }
 0x1ed   :  { %2449 = vmatpush1.bf16.msra.mxu0 %v4364_v38 }
 0x1ee   :  { %2450 = vmatprep.subr.bf16.mxu0 %v4369_v39  ;;  %v2745_v39 = vld [vmem:[%s5961_s11] sm:$0xff] }
 0x1f1   :  { %2451 = vmatpush1.bf16.msra.mxu0 %v4367_v40  ;;  %v2749_v40 = vld [vmem:[%s5961_s11 + $0x20] sm:$0xff] }
 0x1f2   :  { %2452 = vmatprep.subr.bf16.mxu0 %v4372_v41  ;;  %v2748_v41 = vld [vmem:[%s5961_s11 + $0x18] sm:$0xff] }
 0x1f5   :  { %2453 = vmatpush1.bf16.msra.mxu0 %v4370_v43  ;;  %v3782_v43 = vcombine.low %v2745_v39, %v2749_v40 }
 0x1f6   :  { %2454 = vmatprep.subr.bf16.mxu0 %v4375_v44  ;;  %v3783_v44 = vcombine.high %v2745_v39, %v2749_v40  ;;  %v2800_v39 = vld [vmem:[%s5961_s11 + $0x1b8] sm:$0xff] }
 0x1f9   :  { %2455 = vmatpush1.bf16.msra.mxu0 %v4373_v45  ;;  %v2752_v45 = vld [vmem:[%s5961_s11 + $0x38] sm:$0xff] }
 0x1fa   :  { %2456 = vmatprep.subr.bf16.mxu0 %v4378_v46  ;;  %v3788_v46 = vcombine.low %v2748_v41, %v2752_v45 }
 0x1fd   :  { %2457 = vmatpush1.bf16.msra.mxu0 %v4376_v47  ;;  %v3789_v47 = vcombine.high %v2748_v41, %v2752_v45  ;;  %v2805_v45 = vld [vmem:[%s5961_s11 + $0x1e0] sm:$0xff] }
 0x1fe   :  { %2458 = vmatprep.subr.bf16.mxu0 %v4381_v48  ;;  %v2756_v48 = vld [vmem:[%s5961_s11 + $0x58] sm:$0xff] }
 0x201   :  { %2459 = vmatpush1.bf16.msra.mxu0 %v4379_v49  ;;  %v2760_v49 = vld [vmem:[%s5961_s11 + $0x78] sm:$0xff] }
 0x202   :  { %2460 = vmatprep.subr.bf16.mxu0 %v4384_v50  ;;  %v3797_v50 = vcombine.high %v2756_v48, %v2760_v49 }
 0x205   :  { %2461 = vmatpush1.bf16.msra.mxu0 %v4382_v51  ;;  %v2764_v51 = vld [vmem:[%s5961_s11 + $0x98] sm:$0xff] }
 0x206   :  { %2462 = vmatprep.subr.bf16.mxu0 %v4387_v52  ;;  %v2768_v52 = vld [vmem:[%s5961_s11 + $0xb8] sm:$0xff] }
 0x209   :  { %2463 = vmatpush1.bf16.msra.mxu0 %v4385_v53  ;;  %v3796_v53 = vcombine.low %v2756_v48, %v2760_v49  ;;  %v2808_v48 = vld [vmem:[%s5961_s11 + $0x1f8] sm:$0xff] }
 0x20a   :  { %2464 = vmatprep.subr.bf16.mxu0 %v4390_v54  ;;  %v3805_v54 = vcombine.high %v2764_v51, %v2768_v52 }
 0x20d   :  { %2465 = vmatpush1.bf16.msra.mxu0 %v4388_v55  ;;  %v2772_v55 = vld [vmem:[%s5961_s11 + $0xd8] sm:$0xff] }
 0x20e   :  { %2466 = vmatprep.subr.bf16.mxu0 %v4393_v56  ;;  %v2776_v56 = vld [vmem:[%s5961_s11 + $0xf8] sm:$0xff] }
 0x211   :  { %2467 = vmatpush1.bf16.msra.mxu0 %v4391_v57  ;;  %v3804_v57 = vcombine.low %v2764_v51, %v2768_v52  ;;  %v2746_v52 = vld [vmem:[%s5961_s11 + $0x8] sm:$0xff] }
 0x212   :  { %2468 = vmatprep.subr.bf16.mxu0 %v4396_v59  ;;  %v3813_v59 = vcombine.high %v2772_v55, %v2776_v56 }
 0x215   :  { %2469 = vmatpush1.bf16.msra.mxu0 %v4394_v60  ;;  %v2780_v60 = vld [vmem:[%s5961_s11 + $0x118] sm:$0xff] }
 0x216   :  { %2470 = vmatprep.subr.bf16.mxu0 %v4399_v62  ;;  %v3812_v62 = vcombine.low %v2772_v55, %v2776_v56  ;;  %v4497_v56 = vmov 0  }
 0x219   :  { %2471 = vmatpush1.bf16.msra.mxu0 %v4397_v63  ;;  %v3821_v63 = vcombine.high %v2780_v60, %v2784_v61 }
 0x21a   :  { %2472 = vmatprep.subr.bf16.mxu0 %v4402_v1  ;;  %v2792_v1 = vld [vmem:[%s5961_s11 + $0x178] sm:$0xff] }
 0x21b   :  { %v3829_v3 = vcombine.high %v2788_v0, %v2792_v1 }
 0x21d   :  { %2473 = vmatpush1.bf16.msra.mxu0 %v4400_v2  ;;  %v3820_v2 = vcombine.low %v2780_v60, %v2784_v61 }
 0x21e   :  { %3294 = vmatprep.subr.bf16.mxu0 %v3789_v47  ;;  %v2804_v47 = vld [vmem:[%s5961_s11 + $0x1d8] sm:$0xff] }
 0x21f   :  { %v3844_v51 = vcombine.low %v2804_v47, %v2808_v48 }
 0x220   :  { %2475 = vmatmul.mubr.bf16.vlgmr.msra.gmra.mrb[4].mxu0 %v2003_v4  ;;  %v3828_v4 = vcombine.low %v2788_v0, %v2792_v1 }
 0x221   :  { %3295 = vmatpush1.bf16.msra.mxu0 %v3788_v46  ;;  %3326 = vmatprep.mubr.bf16.mxu0 %v4497_v56 }
 0x222   :  { %3296 = vmatprep.subr.bf16.mxu0 %v3797_v50  ;;  %v3845_v50 = vcombine.high %v2804_v47, %v2808_v48 }
 0x225   :  { %3297 = vmatpush1.bf16.msra.mxu0 %v3796_v53  ;;  %v2750_v53 = vld [vmem:[%s5961_s11 + $0x28] sm:$0xff] }
 0x226   :  { %3298 = vmatprep.subr.bf16.mxu0 %v3805_v54  ;;  %v3785_v54 = vcombine.high %v2746_v52, %v2750_v53  ;;  %v3784_v55 = vcombine.low %v2746_v52, %v2750_v53  ;;  %v2779_v53 = vld [vmem:[%s5961_s11 + $0x110] sm:$0xff] }
 0x229   :  { %3299 = vmatpush1.bf16.msra.mxu0 %v3804_v57  ;;  %v3779_v57 = vld [vmem:[%s5959_s9] ss:$0 sm:$0xff] }
 0x22a   :  { %3300 = vmatprep.subr.bf16.mxu0 %v3813_v59 }
 0x22d   :  { %3301 = vmatpush1.bf16.msra.mxu0 %v3812_v62  ;;  %v3781_v62 = vld [vmem:[%s5960_s10] ss:$0 sm:$0xff] }
 0x22e   :  { %3302 = vmatprep.subr.bf16.mxu0 %v3821_v63 }
 0x231   :  { %3303 = vmatpush1.bf16.msra.mxu0 %v3820_v2 }
 0x232   :  { %3304 = vmatprep.subr.bf16.mxu0 %v3829_v3 }
 0x235   :  { %3305 = vmatpush1.bf16.msra.mxu0 %v3828_v4  ;;  %v2754_v4 = vld [vmem:[%s5961_s11 + $0x48] sm:$0xff] }
 0x2f3   :  { %v2476_v16 = vpop.f32.mrb[4].mxu0 }
 0x2f4   :  { %v3880_v17 = vadd.f32 %v2476_v16, %v2074_v13  ;;  %v2478_v18 = vpop.f32.mrb[5].mxu0  ;;  %v2753_v13 = vld [vmem:[%s5961_s11 + $0x40] sm:$0xff] }
 0x2f5   :  { %v3881_v19 = vadd.f32 %v2478_v18, %v2078_v14  ;;  %v2480_v22 = vpop.f32.mrb[6].mxu0  ;;  %v2757_v14 = vld [vmem:[%s5961_s11 + $0x60] sm:$0xff] }
 0x2f6   :  { %v2483_v23 = vmax.f32 %v3880_v17, 0.0  ;;  %v2481_v24 = vpop.f32.mrb[7].mxu0  ;;  %v3791_v18 = vcombine.high %v2753_v13, %v2757_v14  ;;  %v2765_v22 = vld [vmem:[%s5961_s11 + $0xa0] sm:$0xff] }
 0x2f7   :  { %v2484_v25 = vmax.f32 %v3881_v19, 0.0  ;;  %v2761_v19 = vld [vmem:[%s5961_s11 + $0x80] sm:$0xff] }
 0x2f8   :  { %v2485_v27 = vpack.c.bf16 %v2483_v23, %v2483_v23  ;;  %v3790_v23 = vcombine.low %v2753_v13, %v2757_v14  ;;  %v3799_v24 = vcombine.high %v2761_v19, %v2765_v22  ;;  %v2766_v13 = vld [vmem:[%s5961_s11 + $0xa8] sm:$0xff] }
 0x2f9   :  { %v2486_v26 = vpack.c.bf16 %v2484_v25, %v2484_v25  ;;  %v2769_v25 = vld [vmem:[%s5961_s11 + $0xc0] sm:$0xff] }
 0x2fb   :  { %2654 = vmatprep.mubr.bf16.mxu1 %v2486_v26  ;;  %v2773_v26 = vld [vmem:[%s5961_s11 + $0xe0] sm:$0xff] }
 0x2fc   :  { %2655 = vmatmul.mubr.bf16.vlgmr.msra.gmra.mrb[4].mxu1 %v2485_v27  ;;  %v3798_v27 = vcombine.low %v2761_v19, %v2765_v22  ;;  %v3807_v15 = vcombine.high %v2769_v25, %v2773_v26 }
 0x2fd   :  { %3871 = vmatpush3.bf16.msra.mxu1 %v2693_v30  ;;  %3872 = vmatprep.mubr.msk.bf16.mxu1 %vm4496_vm2, %v4493_v29  ;;  %v2781_v29 = vld [vmem:[%s5961_s11 + $0x120] sm:$0xff]  ;;  %v3806_v30 = vcombine.low %v2769_v25, %v2773_v26 }
 0x2fe   :  { %3171 = vmatprep.subr.bf16.mxu1 %v3783_v44  ;;  %v2801_v44 = vld [vmem:[%s5961_s11 + $0x1c0] sm:$0xff] }
 0x2ff   :  { %v3839_v46 = vcombine.high %v2801_v44, %v2805_v45  ;;  %v3838_v49 = vcombine.low %v2801_v44, %v2805_v45  ;;  %v2763_v45 = vld [vmem:[%s5961_s11 + $0x90] sm:$0xff] }
 0x3cf   :  { %v3862_v31 = vpop.f32.mrb[4].mxu1 }
 0x3d0   :  { %v3863_v32 = vpop.f32.mrb[5].mxu1 }
 0x3d1   :  { %v3864_v33 = vadd.f32 %v3863_v32, %v3862_v31  ;;  %v3865_v34 = vpop.f32.mrb[6].mxu1  ;;  %v3815_v31 = vcombine.high %v2777_v28, %v2781_v29  ;;  %v2789_v32 = vld [vmem:[%s5961_s11 + $0x160] sm:$0xff] }
 0x3d2   :  { %v3866_v20 = vpop.f32.mrb[7].mxu1 }
 0x3d3   :  { %v5669_v35 = vadd.f32 %v3864_v33, %v3762_v21  ;;  %v2785_v21 = vld [vmem:[%s5961_s11 + $0x140] sm:$0xff]  ;;  %v3814_v33 = vcombine.low %v2777_v28, %v2781_v29 }
 0x3d4   :  { %v3823_v34 = vcombine.high %v2785_v21, %v2789_v32  ;;  %v3822_v20 = vcombine.low %v2785_v21, %v2789_v32 }
 0x3d5   :  { %3389 = vrot.lane.b32.xlu1 %v5669_v35, %s4494_s29  ;;  %v2663_v36 = vmul.f32 0.5, %v5669_v35  ;;  %3388 = vst.msk [vmem:[#allocation4] sm:$0x3] %vm3381_vm1, %v5669_v35 }
 0x3d7   :  { %v2664_v37 = vmul.f32 1.442695, %v2663_v36  ;;  %v2797_v36 = vld [vmem:[%s5961_s11 + $0x1a0] sm:$0xff] }
 0x3d9   :  { %3383 = vrot.lane.b32.xlu1 %v5669_v35, %s4495_s8  ;;  %4419 = vpow2.f32 %v2664_v37 }
 0x3e3   :  { %v4420_v38 = vpop.eup %4419 }
 0x3e4   :  { %2667 = vrot.lane.b32.xlu0 %v4420_v38, %s4494_s29  ;;  %v2796_v38 = vld [vmem:[%s5961_s11 + $0x198] sm:$0xff]  ;;  %s4421_s29 = scalar_lea.vmem %s3414_s5, 32 }
 0x3e5   :  { %v3837_v41 = vcombine.high %v2796_v38, %v2800_v39  ;;  %p4422_p0 = scmp.ne.s32.totalorder %s3414_s5, %s4421_s29  ;;  %p4427_p2 = scmp.lt.s32.totalorder %s4421_s29, %s4421_s29 }
 0x3e7   :  { %3306 = vmatprep.subr.bf16.mxu0 %v3837_v41  ;;  %v2759_v41 = vld [vmem:[%s5961_s11 + $0x70] sm:$0xff]  ;;  %p4428_p3 = por %p4427_p2, %p4426_p1 }
 0x3e8   :  { %2677 = vperm.xlu0 %3921, %v5669_v35  }
 0x3e9   :  { %p4429_p4 = pnand %p4428_p3, %p4422_p0 }
 0x447   :  { %v3390_v5 = vpop.permute.xlu1 %3389 }
 0x448   :  { %3392 = vst.msk [vmem:[#allocation6] sm:$0x3] %vm3381_vm1, %v3390_v5  ;;  %v2758_v5 = vld [vmem:[%s5961_s11 + $0x68] sm:$0xff] }
 0x449   :  { %v3792_v14 = vcombine.low %v2754_v4, %v2758_v5 }
 0x44b   :  { %v3384_v6 = vpop.permute.xlu1 %3383 }
 0x44c   :  { %3387 = vst.msk [vmem:[%s5965_s15] sm:$0x3] %vm3386_vm3, %v3384_v6 }
 0x456   :  { %v2668_v9 = vpop.permute.xlu0 %2667 }
 0x457   :  { %v2670_v12 = vmul.f32 %v2668_v9, %v2662_v7  ;;  %v3793_v9 = vcombine.high %v2754_v4, %v2758_v5 }
 0x459   :  { %v2671_v16 = vadd.f32 %v2670_v12, %v5669_v35  ;;  %v2793_v35 = vld [vmem:[%s5961_s11 + $0x180] sm:$0xff]  ;;  %v2762_v12 = vld [vmem:[%s5961_s11 + $0x88] sm:$0xff] }
 0x45a   :  { %v3831_v37 = vcombine.high %v2793_v35, %v2797_v36  ;;  %v3830_v40 = vcombine.low %v2793_v35, %v2797_v36  ;;  %v3800_v19 = vcombine.low %v2762_v12, %v2766_v13  ;;  %v2747_v36 = vld [vmem:[%s5961_s11 + $0x10] sm:$0xff] }
 0x45b   :  { %v2672_v17 = vpack.c.bf16 %v2671_v16, %v2671_v16  ;;  %3382 = vst.msk [vmem:[#allocation2] sm:$0x3] %vm3381_vm1, %v2671_v16  ;;  %v3801_v16 = vcombine.high %v2762_v12, %v2766_v13 }
 0x45d   :  { %3873 = vmatmul.mubr.msk.bf16.vlgmr.msra.gmra.mrb[8].mxu1 %vm2687_vm4, %v2672_v17  ;;  %v2770_v17 = vld [vmem:[%s5961_s11 + $0xc8] sm:$0xff] }
 0x45e   :  { %3172 = vmatpush1.bf16.msra.mxu1 %v3782_v43  ;;  %v3836_v43 = vcombine.low %v2796_v38, %v2800_v39  ;;  %3203 = vmatprep.mubr.bf16.mxu1 %v4497_v56 }
 0x45f   :  { %3173 = vmatprep.subr.bf16.mxu1 %v3791_v18  ;;  %v2774_v18 = vld [vmem:[%s5961_s11 + $0xe8] sm:$0xff] }
 0x460   :  { %3307 = vmatpush1.bf16.msra.mxu0 %v3836_v43  ;;  %v3809_v22 = vcombine.high %v2770_v17, %v2774_v18  ;;  %v3808_v25 = vcombine.low %v2770_v17, %v2774_v18 }
 0x461   :  { %3308 = vmatprep.subr.bf16.mxu0 %v3845_v50  ;;  %v2775_v50 = vld [vmem:[%s5961_s11 + $0xf0] sm:$0xff] }
 0x462   :  { %3174 = vmatpush1.bf16.msra.mxu1 %v3790_v23  ;;  %v2778_v23 = vld [vmem:[%s5961_s11 + $0x108] sm:$0xff] }
 0x463   :  { %3175 = vmatprep.subr.bf16.mxu1 %v3799_v24  ;;  %v2782_v24 = vld [vmem:[%s5961_s11 + $0x128] sm:$0xff] }
 0x464   :  { %3309 = vmatpush1.bf16.msra.mxu0 %v3844_v51  ;;  %v3817_v26 = vcombine.high %v2778_v23, %v2782_v24  ;;  %v3816_v28 = vcombine.low %v2778_v23, %v2782_v24 }
 0x466   :  { %3176 = vmatpush1.bf16.msra.mxu1 %v3798_v27  ;;  %v2786_v27 = vld [vmem:[%s5961_s11 + $0x148] sm:$0xff] }
 0x467   :  { %3177 = vmatprep.subr.bf16.mxu1 %v3807_v15  ;;  %v2678_v59 = vpop.permute.xlu0 %2677  ;;  %v2790_v15 = vld [vmem:[%s5961_s11 + $0x168] sm:$0xff] }
 0x468   :  { %v2686_v60 = vmul.f32 %v3779_v57, %v2678_v59  ;;  %v3825_v29 = vcombine.high %v2786_v27, %v2790_v15  ;;  %v3824_v21 = vcombine.low %v2786_v27, %v2790_v15  ;;  %v2787_v57 = vld [vmem:[%s5961_s11 + $0x150] sm:$0xff] }
 0x469   :  { %v2791_v59 = vld [vmem:[%s5961_s11 + $0x170] sm:$0xff] }
 0x46a   :  { %3178 = vmatpush1.bf16.msra.mxu1 %v3806_v30  ;;  %v2794_v30 = vld [vmem:[%s5961_s11 + $0x188] sm:$0xff] }
 0x46b   :  { %3179 = vmatprep.subr.bf16.mxu1 %v3815_v31  ;;  %v2798_v31 = vld [vmem:[%s5961_s11 + $0x1a8] sm:$0xff] }
 0x46c   :  { %v3833_v32 = vcombine.high %v2794_v30, %v2798_v31 }
 0x46e   :  { %3180 = vmatpush1.bf16.msra.mxu1 %v3814_v33  ;;  %v2802_v33 = vld [vmem:[%s5961_s11 + $0x1c8] sm:$0xff] }
 0x46f   :  { %3181 = vmatprep.subr.bf16.mxu1 %v3823_v34  ;;  %v2806_v34 = vld [vmem:[%s5961_s11 + $0x1e8] sm:$0xff] }
 0x470   :  { %v3841_v35 = vcombine.high %v2802_v33, %v2806_v34  ;;  %v3840_v38 = vcombine.low %v2802_v33, %v2806_v34 }
 0x472   :  { %3182 = vmatpush1.bf16.msra.mxu1 %v3822_v20  ;;  %v3832_v20 = vcombine.low %v2794_v30, %v2798_v31 }
 0x473   :  { %3183 = vmatprep.subr.bf16.mxu1 %v3831_v37  ;;  %v2751_v37 = vld [vmem:[%s5961_s11 + $0x30] sm:$0xff] }
 0x474   :  { %v3787_v39 = vcombine.high %v2747_v36, %v2751_v37  ;;  %v3786_v43 = vcombine.low %v2747_v36, %v2751_v37 }
 0x476   :  { %3184 = vmatpush1.bf16.msra.mxu1 %v3830_v40  ;;  %v2755_v40 = vld [vmem:[%s5961_s11 + $0x50] sm:$0xff] }
 0x477   :  { %3185 = vmatprep.subr.bf16.mxu1 %v3839_v46  ;;  %v3795_v44 = vcombine.high %v2755_v40, %v2759_v41  ;;  %v2767_v46 = vld [vmem:[%s5961_s11 + $0xb0] sm:$0xff]  ;;  %v3794_v47 = vcombine.low %v2755_v40, %v2759_v41 }
 0x478   :  { %v3803_v48 = vcombine.high %v2763_v45, %v2767_v46  ;;  %v3802_v51 = vcombine.low %v2763_v45, %v2767_v46 }
 0x47a   :  { %3186 = vmatpush1.bf16.msra.mxu1 %v3838_v49  ;;  %v2771_v49 = vld [vmem:[%s5961_s11 + $0xd0] sm:$0xff] }
 0x47b   :  { %3212 = vmatprep.subr.bf16.mxu1 %v3785_v54  ;;  %v3811_v52 = vcombine.high %v2771_v49, %v2775_v50  ;;  %v2783_v54 = vld [vmem:[%s5961_s11 + $0x130] sm:$0xff] }
 0x530   :  { %v2729_v61 = vpop.f32.mrb[8].mxu1 }
 0x531   :  { %v2730_v63 = vadd.f32 %v2729_v61, %v2686_v60  ;;  %v3874_v0 = vpop.f32.mrb[9].mxu1  ;;  %v3818_v60 = vcombine.low %v2779_v53, %v2783_v54  ;;  %v3827_v61 = vcombine.high %v2787_v57, %v2791_v59 }
 0x532   :  { %v2732_v1 = vpop.f32.mrb[10].mxu1  ;;  %v3826_v0 = vcombine.low %v2787_v57, %v2791_v59 }
 0x533   :  { %v2742_v2 = vadd.f32 %v3781_v62, %v2730_v63  ;;  %v3875_v3 = vpop.f32.mrb[11].mxu1  ;;  %v2795_v62 = vld [vmem:[%s5961_s11 + $0x190] sm:$0xff] }
 0x534   :  { %v2799_v63 = vld [vmem:[%s5961_s11 + $0x1b0] sm:$0xff] }
 0x535   :  { %v2743_v6 = vmax.f32 %v2742_v2, 0.0  ;;  %v3835_v1 = vcombine.high %v2795_v62, %v2799_v63  ;;  %v2803_v2 = vld [vmem:[%s5961_s11 + $0x1d0] sm:$0xff]  ;;  %v3834_v4 = vcombine.low %v2795_v62, %v2799_v63 }
 0x536   :  { %v2807_v3 = vld [vmem:[%s5961_s11 + $0x1f0] sm:$0xff] }
 0x537   :  { %v5802_v7 = vpack.c.bf16 %v2743_v6, %v2743_v6  ;;  %v3843_v5 = vcombine.high %v2803_v2, %v2807_v3  ;;  %v3842_v6 = vcombine.low %v2803_v2, %v2807_v3 }
 0x539   :  { %3204 = vmatmul.mubr.bf16.vlgmr.msra.gmra.mrb[12].mxu1 %v5802_v7  ;;  %3327 = vmatmul.mubr.bf16.vlgmr.msra.gmra.mrb[8].mxu0 %v5802_v7 }
 0x53a   :  { %3213 = vmatpush1.bf16.msra.mxu1 %v3784_v55  ;;  %3244 = vmatprep.mubr.bf16.mxu1 %v4497_v56  ;;  %v3810_v55 = vcombine.low %v2771_v49, %v2775_v50 }
 0x53b   :  { %3214 = vmatprep.subr.bf16.mxu1 %v3793_v9 }
 0x53e   :  { %3215 = vmatpush1.bf16.msra.mxu1 %v3792_v14 }
 0x53f   :  { %3216 = vmatprep.subr.bf16.mxu1 %v3801_v16 }
 0x542   :  { %3217 = vmatpush1.bf16.msra.mxu1 %v3800_v19 }
 0x543   :  { %3218 = vmatprep.subr.bf16.mxu1 %v3809_v22 }
 0x546   :  { %3219 = vmatpush1.bf16.msra.mxu1 %v3808_v25 }
 0x547   :  { %3220 = vmatprep.subr.bf16.mxu1 %v3817_v26 }
 0x54a   :  { %3221 = vmatpush1.bf16.msra.mxu1 %v3816_v28 }
 0x54b   :  { %3222 = vmatprep.subr.bf16.mxu1 %v3825_v29 }
 0x54e   :  { %3223 = vmatpush1.bf16.msra.mxu1 %v3824_v21 }
 0x54f   :  { %3224 = vmatprep.subr.bf16.mxu1 %v3833_v32 }
 0x552   :  { %3225 = vmatpush1.bf16.msra.mxu1 %v3832_v20 }
 0x553   :  { %3226 = vmatprep.subr.bf16.mxu1 %v3841_v35 }
 0x556   :  { %3227 = vmatpush1.bf16.msra.mxu1 %v3840_v38 }
 0x557   :  { %3253 = vmatprep.subr.bf16.mxu1 %v3787_v39 }
 0x559   :  { %3245 = vmatmul.mubr.bf16.vlgmr.msra.gmra.mrb[16].mxu1 %v5802_v7 }
 0x55a   :  { %3254 = vmatpush1.bf16.msra.mxu1 %v3786_v43  ;;  %3285 = vmatprep.mubr.bf16.mxu1 %v4497_v56  ;;  %v3819_v56 = vcombine.high %v2779_v53, %v2783_v54 }
 0x55b   :  { %3255 = vmatprep.subr.bf16.mxu1 %v3795_v44 }
 0x55e   :  { %3256 = vmatpush1.bf16.msra.mxu1 %v3794_v47 }
 0x55f   :  { %3257 = vmatprep.subr.bf16.mxu1 %v3803_v48 }
 0x562   :  { %3258 = vmatpush1.bf16.msra.mxu1 %v3802_v51 }
 0x563   :  { %3259 = vmatprep.subr.bf16.mxu1 %v3811_v52 }
 0x566   :  { %3260 = vmatpush1.bf16.msra.mxu1 %v3810_v55 }
 0x567   :  { %3261 = vmatprep.subr.bf16.mxu1 %v3819_v56 }
 0x56a   :  { %3262 = vmatpush1.bf16.msra.mxu1 %v3818_v60 }
 0x56b   :  { %3263 = vmatprep.subr.bf16.mxu1 %v3827_v61 }
 0x56e   :  { %3264 = vmatpush1.bf16.msra.mxu1 %v3826_v0 }
 0x56f   :  { %3265 = vmatprep.subr.bf16.mxu1 %v3835_v1 }
 0x572   :  { %3266 = vmatpush1.bf16.msra.mxu1 %v3834_v4 }
 0x573   :  { %3267 = vmatprep.subr.bf16.mxu1 %v3843_v5 }
 0x576   :  { %3268 = vmatpush1.bf16.msra.mxu1 %v3842_v6 }
 0x579   :  { %3286 = vmatmul.mubr.bf16.vlgmr.msra.gmra.mrb[20].mxu1 %v5802_v7 }
 0x57a   :  { %4432 = shalt.err (!%p4429_p4)
}
 0x57b   :  { %s4433_s7 = scalar_lea.hbm %s5966_s16, 32 }
 0x57c   :  { %p4434_p5 = scmp.ne.s32.totalorder %s5966_s16, %s4433_s7  ;;  %p4437_p6 = scmp.lt.u32.totalorder %s4433_s7, %s5966_s16 }
 0x57e   :  { %p4439_p7 = pnand %p4437_p6, %p4434_p5 }
 0x580   :  { %4442 = shalt.err (!%p4439_p7)
}
 0x581   :  { %3416 = dma.vmem_to_hbm [thread:$0]  %s3414_s5, 32, %s5966_s16, [#allocation5]  }
 0x582   :  { %s4443_s20 = scalar_lea.vmem %s3402_s28, 32  ;;  %p4448_p9 = scmp.lt.s32.totalorder %s3402_s28, %s3402_s28 }
 0x583   :  { %p4444_p8 = scmp.ne.s32.totalorder %s3402_s28, %s4443_s20  ;;  %p4449_p10 = scmp.lt.s32.totalorder %s4443_s20, %s4443_s20 }
 0x585   :  { %p4450_p11 = por %p4449_p10, %p4448_p9 }
 0x587   :  { %p4451_p12 = pnand %p4450_p11, %p4444_p8 }
 0x589   :  { %4454 = shalt.err (!%p4451_p12)
}
 0x58a   :  { %s4455_s23 = scalar_lea.hbm %s5964_s14, 32 }
 0x58b   :  { %p4456_p13 = scmp.ne.s32.totalorder %s5964_s14, %s4455_s23  ;;  %p4459_p0 = scmp.lt.u32.totalorder %s4455_s23, %s5964_s14 }
 0x58d   :  { %p4461_p1 = pnand %p4459_p0, %p4456_p13 }
 0x58f   :  { %4464 = shalt.err (!%p4461_p1)
}
 0x590   :  { %3404 = dma.vmem_to_hbm [thread:$0]  %s3402_s28, 32, %s5964_s14, [#allocation3]  }
 0x591   :  { %s4500_s25 = smov [#allocation6]  }
 0x592   :  { %s3423_s15 = sshll.u32 %s4500_s25, 4  ;;  %s3424_s15 = int_to_ptr.vmem [resolvable:$true] %s3423_s15 }
 0x593   :  { %s4465_s26 = scalar_lea.vmem %s3424_s15, 32  ;;  %p4470_p3 = scmp.lt.s32.totalorder %s3424_s15, %s3424_s15 }
 0x594   :  { %p4466_p2 = scmp.ne.s32.totalorder %s3424_s15, %s4465_s26  ;;  %p4471_p4 = scmp.lt.s32.totalorder %s4465_s26, %s4465_s26 }
 0x596   :  { %p4472_p5 = por %p4471_p4, %p4470_p3 }
 0x598   :  { %p4473_p6 = pnand %p4472_p5, %p4466_p2 }
 0x59a   :  { %4476 = shalt.err (!%p4473_p6)
}
 0x59b   :  { %s4477_s27 = scalar_lea.hbm %s5967_s17, 32 }
 0x59c   :  { %p4478_p7 = scmp.ne.s32.totalorder %s5967_s17, %s4477_s27  ;;  %p4481_p8 = scmp.lt.u32.totalorder %s4477_s27, %s5967_s17 }
 0x59e   :  { %p4483_p9 = pnand %p4481_p8, %p4478_p7 }
 0x5a0   :  { %4486 = shalt.err (!%p4483_p9)
}
 0x5a1   :  { %3426 = dma.vmem_to_hbm [thread:$0]  %s3424_s15, 32, %s5967_s17, [#allocation5]   ;;  %v2837_v7 = vsub.s32 6, %v4709_v42  ;;  %v2809_v9 = vld [vmem:[%s5962_s12] sm:$0xff]  ;;  %v2841_v12 = vsub.s32 7, %v4709_v42 }
 0x5a2   :  { %v2814_v13 = vrot.slane %v2809_v9, %v5528_v8  ;;  %v2818_v16 = vrot.slane %v2809_v9, %v5536_v10  ;;  %v4501_v32 = vmov 1983009808   ;;  %v2822_v10 = vrot.slane %v2809_v9, %v321_v58 }
 0x5a3   :  { %v2838_v14 = vrot.slane %v2809_v9, %v2837_v7  ;;  %v2842_v17 = vrot.slane %v2809_v9, %v2841_v12  ;;  %v3346_v8 = vunpack.c.l.s4 %v4501_v32  ;;  %v2826_v34 = vrot.slane %v2809_v9, %v325_v11 }
 0x5a4   :  { %v2829_v58 = vsub.s32 4, %v4709_v42  ;;  %v2833_v11 = vsub.s32 5, %v4709_v42 }
 0x5a5   :  { %v3347_v33 = vunpack.c.0.s8 %v3346_v8 }
 0x5a6   :  { %v2830_v46 = vrot.slane %v2809_v9, %v2829_v58  ;;  %v2834_v47 = vrot.slane %v2809_v9, %v2833_v11 }
 0x5a7   :  { %v3350_v37 = vsub.s32 %v3347_v33, %v4709_v42 }
 0x60c   :  { %v3205_v18 = vpop.f32.mrb[12].mxu1  ;;  %v3328_v19 = vpop.f32.mrb[8].mxu0 }
 0x60d   :  { %v3206_v22 = vadd.f32 %v3205_v18, %v2814_v13  ;;  %v3329_v23 = vadd.f32 %v3328_v19, %v2838_v14  ;;  %v3207_v24 = vpop.f32.mrb[13].mxu1  ;;  %v3330_v25 = vpop.f32.mrb[9].mxu0 }
 0x60e   :  { %v3208_v26 = vadd.f32 %v3207_v24, %v2818_v16  ;;  %v3331_v27 = vadd.f32 %v3330_v25, %v2842_v17  ;;  %v3209_v15 = vpop.f32.mrb[14].mxu1  ;;  %v3332_v28 = vpop.f32.mrb[10].mxu0 }
 0x60f   :  { %v3210_v29 = vpop.f32.mrb[15].mxu1  ;;  %v3333_v30 = vpop.f32.mrb[11].mxu0 }
 0x610   :  { %v3343_v31 = vcombine.low %v3206_v22, %v3208_v26  ;;  %v3361_v21 = vcombine.low %v3329_v23, %v3331_v27 }
 0x612   :  { %v3351_v43 = vrot.slane %v3343_v31, %v3350_v37  ;;  %v3375_v55 = vrot.slane %v3361_v21, %v3350_v37 }
 0x62c   :  { %v3246_v20 = vpop.f32.mrb[16].mxu1 }
 0x62d   :  { %v3247_v35 = vadd.f32 %v3246_v20, %v2822_v10  ;;  %v3248_v36 = vpop.f32.mrb[17].mxu1 }
 0x62e   :  { %v3249_v38 = vadd.f32 %v3248_v36, %v2826_v34  ;;  %v3250_v39 = vpop.f32.mrb[18].mxu1 }
 0x62f   :  { %v3251_v40 = vpop.f32.mrb[19].mxu1 }
 0x630   :  { %v3344_v41 = vcombine.low %v3247_v35, %v3249_v38 }
 0x632   :  { %v3358_v44 = vrot.slane %v3344_v41, %v3350_v37 }
 0x634   :  { %v3359_v45 = vcombine.low %v3351_v43, %v3358_v44 }
 0x636   :  { %3379 = vst [vmem:[%s5963_s13] sm:$0xff] %v3359_v45 }
 0x64c   :  { %v3287_v48 = vpop.f32.mrb[20].mxu1 }
 0x64d   :  { %v3288_v49 = vadd.f32 %v3287_v48, %v2830_v46  ;;  %v3289_v50 = vpop.f32.mrb[21].mxu1 }
 0x64e   :  { %v3290_v51 = vadd.f32 %v3289_v50, %v2834_v47  ;;  %v3291_v52 = vpop.f32.mrb[22].mxu1 }
 0x64f   :  { %v3292_v53 = vpop.f32.mrb[23].mxu1 }
 0x650   :  { %v3360_v54 = vcombine.low %v3288_v49, %v3290_v51 }
 0x652   :  { %v3368_v56 = vrot.slane %v3360_v54, %v3350_v37 }
 0x654   :  { %v3376_v57 = vcombine.low %v3368_v56, %v3375_v55 }
 0x656   :  { %3380 = vst [vmem:[%s5963_s13 + $0x8] sm:$0xff] %v3376_v57 }
 0x657   :  { %4487 = dma.done.wait [#allocation3], 32  }
 0x658   :  { %4488 = vsyncadd [#allocation3], 4294967264 }
 0x659   :  { %4489 = dma.done.wait [#allocation5], 64  }
 0x65a   :  { %4490 = vsyncadd [#allocation5], 4294967232 }
 0x65b   :  { %3440 = vsyncpa [#allocation3], 1 }
 0x65c   :  { %3441 = vsyncpa [#allocation5], 1 }

</bundles_post_ra>
